<compile_context>
chip_gen: v7x
topology: tpu7x:2x2x1
jax: 0.10.0
libtpu: 0.0.40
codegen_flags: <defaults>
</compile_context>

<pallas_src>
import functools
import math

import jax
import jax.numpy as jnp
from jax.experimental import pallas as pl
from jax.experimental.pallas import tpu as pltpu

DTYPE = jnp.bfloat16            # storage dtype (weights + activations)
VMEM_LIMIT = 32 * 1024 * 1024   # conservative scoped-VMEM budget (safe on v5e/v6e/v7x)


# ----------------------------------------------------------------------------
# tiling helpers
# ----------------------------------------------------------------------------

def _pick_tile(dim, target, align):
    """Largest tile <= target that divides `dim` and is a multiple of `align`;
    falls back to the full dim (single block) so shapes are always legal."""
    if dim <= target:
        return dim
    t = (target // align) * align
    while t >= align:
        if dim % t == 0:
            return t
        t -= align
    return dim


def _lane_tile(dim, target=512):
    # v6e/v7x MXU is 2x256^2: prefer 256-multiples when possible, else 128.
    align = 256 if dim % 256 == 0 else 128
    return _pick_tile(dim, target, align)


def _row_tile(dim, target=256):
    return _pick_tile(dim, target, 8)


def _mosaic(dims):
    return pltpu.CompilerParams(dimension_semantics=dims,
                                vmem_limit_bytes=VMEM_LIMIT)


# ----------------------------------------------------------------------------
# Pallas kernels
# ----------------------------------------------------------------------------

def matmul_bias_kernel(x_ref, w_ref, b_ref, o_ref, acc_ref):
    # Tiled (tm,tk)@(tk,tn) with f32 accumulation over the K grid axis.
    @pl.when(pl.program_id(2) == 0)
    def _():
        acc_ref[...] = jnp.zeros_like(acc_ref)
    acc_ref[...] += jnp.dot(x_ref[...], w_ref[...],
                            preferred_element_type=jnp.float32)

    @pl.when(pl.program_id(2) == pl.num_programs(2) - 1)
    def _():
        o_ref[...] = (acc_ref[...] + b_ref[...].astype(jnp.float32)).astype(o_ref.dtype)


def matmul_bias_residual_kernel(x_ref, w_ref, b_ref, r_ref, o_ref, acc_ref):
    # Same as above but fuses the residual add into the epilogue.
    @pl.when(pl.program_id(2) == 0)
    def _():
        acc_ref[...] = jnp.zeros_like(acc_ref)
    acc_ref[...] += jnp.dot(x_ref[...], w_ref[...],
                            preferred_element_type=jnp.float32)

    @pl.when(pl.program_id(2) == pl.num_programs(2) - 1)
    def _():
        o_ref[...] = (acc_ref[...] + b_ref[...].astype(jnp.float32)
                      + r_ref[...].astype(jnp.float32)).astype(o_ref.dtype)


def _layernorm_f32(x, g, b, eps):
    mu = jnp.mean(x, axis=-1, keepdims=True)
    var = jnp.mean(jnp.square(x - mu), axis=-1, keepdims=True)
    return (x - mu) * jax.lax.rsqrt(var + eps) * g + b


def ln_matmul_bias_kernel(x_ref, g_ref, b_ref, w_ref, bias_ref, o_ref, *, eps):
    # Fused LayerNorm + matmul + bias (LN needs the full row, so K is un-tiled).
    x = x_ref[...].astype(jnp.float32)
    h = _layernorm_f32(x, g_ref[...].astype(jnp.float32),
                       b_ref[...].astype(jnp.float32), eps)
    acc = jnp.dot(h.astype(w_ref.dtype), w_ref[...],
                  preferred_element_type=jnp.float32)
    o_ref[...] = (acc + bias_ref[...].astype(jnp.float32)).astype(o_ref.dtype)


def ln_matmul_dual_kernel(x_ref, g_ref, b_ref, w_ref, h_ref, o_ref, *, eps):
    # Fused final LayerNorm + lm_head (no bias).  Emits both the normalized hidden
    # states (needed for the EOS gather / classification head) and the logits tile,
    # saving one HBM round-trip of the hidden states and one kernel launch.
    x = x_ref[...].astype(jnp.float32)
    h = _layernorm_f32(x, g_ref[...].astype(jnp.float32),
                       b_ref[...].astype(jnp.float32), eps)
    h_ref[...] = h.astype(h_ref.dtype)
    o_ref[...] = jnp.dot(h.astype(w_ref.dtype), w_ref[...],
                         preferred_element_type=jnp.float32).astype(o_ref.dtype)


def ln_mlp_residual_kernel(x_ref, g_ref, b_ref, w1_ref, b1_ref, w2_ref, b2_ref,
                           o_ref, *, eps):
    # Fused LayerNorm2 -> fc -> gelu_new -> proj -> + residual.  Elementwise math in f32.
    x = x_ref[...].astype(jnp.float32)
    h = _layernorm_f32(x, g_ref[...].astype(jnp.float32),
                       b_ref[...].astype(jnp.float32), eps)
    a = jnp.dot(h.astype(w1_ref.dtype), w1_ref[...],
                preferred_element_type=jnp.float32) + b1_ref[...].astype(jnp.float32)
    c = math.sqrt(2.0 / math.pi)
    a = 0.5 * a * (1.0 + jnp.tanh(c * (a + 0.044715 * a * a * a)))      # gelu_new
    out = jnp.dot(a.astype(w2_ref.dtype), w2_ref[...],
                  preferred_element_type=jnp.float32)
    out = out + b2_ref[...].astype(jnp.float32) + x
    o_ref[...] = out.astype(o_ref.dtype)


def attention_kernel(qkv_ref, o_ref, *, n_head, d_head, scale):
    # qkv_ref: (1, S, 3*D) head-packed QKV straight from the fused ln1+QKV matmul.
    # o_ref  : (1, S, D).  All heads of one batch element per grid step; no k.T
    # (dot_general contracts on the feature axis) and a single lane-dense store.
    # TODO(synk): for long sequences switch to a flash-style blocked-KV online softmax.
    S = qkv_ref.shape[1]
    D = n_head * d_head
    qkv = qkv_ref[0]
    row = jax.lax.broadcasted_iota(jnp.int32, (S, S), 0)
    col = jax.lax.broadcasted_iota(jnp.int32, (S, S), 1)
    causal = col <= row
    neg = jnp.float32(-1e30)
    outs = []
    for h in range(n_head):
        q = qkv[:, h * d_head:(h + 1) * d_head]
        k = qkv[:, D + h * d_head:D + (h + 1) * d_head]
        v = qkv[:, 2 * D + h * d_head:2 * D + (h + 1) * d_head]
        s = jax.lax.dot_general(q, k, (((1,), (1,)), ((), ())),
                                preferred_element_type=jnp.float32) * scale
        s = jnp.where(causal, s, neg)
        s = s - jnp.max(s, axis=-1, keepdims=True)
        p = jnp.exp(s)
        p = p * pl.reciprocal(jnp.sum(p, axis=-1, keepdims=True), approx=True)
        outs.append(jnp.dot(p.astype(v.dtype), v,
                            preferred_element_type=jnp.float32))
    o_ref[0] = jnp.concatenate(outs, axis=-1).astype(o_ref.dtype)


def xent_kernel(logits_ref, labels_ref, sum_ref, cnt_ref, sacc_ref, cacc_ref, *, pad_idx):
    # Streaming CrossEntropyLoss(ignore_index=pad_idx): row tiles accumulate
    # (sum of -log p, #valid) across the grid in VMEM scratch.
    @pl.when(pl.program_id(0) == 0)
    def _():
        sacc_ref[...] = jnp.zeros_like(sacc_ref)
        cacc_ref[...] = jnp.zeros_like(cacc_ref)

    logits = logits_ref[...].astype(jnp.float32)          # (tr, V)
    lbl = labels_ref[...]                                  # (tr, 1) int32
    m = jnp.max(logits, axis=-1, keepdims=True)
    lse = jnp.log(jnp.sum(jnp.exp(logits - m), axis=-1, keepdims=True)) + m
    col = jax.lax.broadcasted_iota(jnp.int32, logits.shape, 1)
    onehot = (col == lbl).astype(jnp.float32)
    picked = jnp.sum(onehot * logits, axis=-1, keepdims=True)
    valid = (lbl != pad_idx).astype(jnp.float32)
    sacc_ref[...] += jnp.sum((lse - picked) * valid).reshape(1, 1)
    cacc_ref[...] += jnp.sum(valid).reshape(1, 1)

    @pl.when(pl.program_id(0) == pl.num_programs(0) - 1)
    def _():
        sum_ref[...] = sacc_ref[...]
        cnt_ref[...] = cacc_ref[...]


# ----------------------------------------------------------------------------
# pallas_call wrappers
# ----------------------------------------------------------------------------

def pallas_matmul(x, w, b=None, *, residual=None, out_dtype=None):
    """Tiled (M,K)@(K,N) + b [+ residual] with f32 VMEM accumulation over K."""
    M, K = x.shape
    N = w.shape[1]
    out_dtype = out_dtype or x.dtype
    tm, tn, tk = _row_tile(M), _lane_tile(N, 256), _lane_tile(K, 512)
    grid = (M // tm, N // tn, K // tk)
    if b is None:
        b = jnp.zeros((N,), w.dtype)
    b2 = b.reshape(1, N).astype(w.dtype)

    in_specs = [pl.BlockSpec((tm, tk), lambda i, j, k: (i, k)),
                pl.BlockSpec((tk, tn), lambda i, j, k: (k, j)),
                pl.BlockSpec((1, tn), lambda i, j, k: (0, j))]
    args = [x, w, b2]
    kernel = matmul_bias_kernel
    if residual is not None:
        in_specs.append(pl.BlockSpec((tm, tn), lambda i, j, k: (i, j)))
        args.append(residual)
        kernel = matmul_bias_residual_kernel

    return pl.pallas_call(
        kernel,
        out_shape=jax.ShapeDtypeStruct((M, N), out_dtype),
        grid=grid,
        in_specs=in_specs,
        out_specs=pl.BlockSpec((tm, tn), lambda i, j, k: (i, j)),
        scratch_shapes=[pltpu.VMEM((tm, tn), jnp.float32)],
        compiler_params=_mosaic(("parallel", "parallel", "arbitrary")),
    )(*args)


def pallas_ln_matmul(x, g, b, w, bias, eps):
    """Fused LayerNorm + (ln(x) @ W + bias), tiled over rows and output columns."""
    M, D = x.shape
    N = w.shape[1]
    tm, tn = _row_tile(M), _lane_tile(N, 512)
    return pl.pallas_call(
        functools.partial(ln_matmul_bias_kernel, eps=eps),
        out_shape=jax.ShapeDtypeStruct((M, N), x.dtype),
        grid=(M // tm, N // tn),
        in_specs=[pl.BlockSpec((tm, D), lambda i, j: (i, 0)),
                  pl.BlockSpec((1, D), lambda i, j: (0, 0)),
                  pl.BlockSpec((1, D), lambda i, j: (0, 0)),
                  pl.BlockSpec((D, tn), lambda i, j: (0, j)),
                  pl.BlockSpec((1, tn), lambda i, j: (0, j))],
        out_specs=pl.BlockSpec((tm, tn), lambda i, j: (i, j)),
        compiler_params=_mosaic(("parallel", "parallel")),
    )(x, g.reshape(1, D), b.reshape(1, D), w, bias.reshape(1, N))


def pallas_ln_matmul_dual(x, g, b, w, eps):
    """Fused final LayerNorm + lm_head (no bias): returns (hidden_normed, logits)."""
    M, D = x.shape
    N = w.shape[1]
    tm, tn = _row_tile(M), _lane_tile(N, 512)
    h, o = pl.pallas_call(
        functools.partial(ln_matmul_dual_kernel, eps=eps),
        out_shape=(jax.ShapeDtypeStruct((M, D), x.dtype),
                   jax.ShapeDtypeStruct((M, N), x.dtype)),
        grid=(M // tm, N // tn),
        in_specs=[pl.BlockSpec((tm, D), lambda i, j: (i, 0)),
                  pl.BlockSpec((1, D), lambda i, j: (0, 0)),
                  pl.BlockSpec((1, D), lambda i, j: (0, 0)),
                  pl.BlockSpec((D, tn), lambda i, j: (0, j))],
        out_specs=(pl.BlockSpec((tm, D), lambda i, j: (i, 0)),   # resident across j
                   pl.BlockSpec((tm, tn), lambda i, j: (i, j))),
        compiler_params=_mosaic(("parallel", "arbitrary")),
    )(x, g.reshape(1, D), b.reshape(1, D), w)
    return h, o


def pallas_ln_mlp_residual(x, g, b, w1, b1, w2, b2, eps):
    """Fused LayerNorm2 + MLP(gelu_new) + residual, tiled over rows."""
    M, D = x.shape
    F = w1.shape[1]
    tm = _row_tile(M, 128)
    return pl.pallas_call(
        functools.partial(ln_mlp_residual_kernel, eps=eps),
        out_shape=jax.ShapeDtypeStruct((M, D), x.dtype),
        grid=(M // tm,),
        in_specs=[pl.BlockSpec((tm, D), lambda i: (i, 0)),
                  pl.BlockSpec((1, D), lambda i: (0, 0)),
                  pl.BlockSpec((1, D), lambda i: (0, 0)),
                  pl.BlockSpec((D, F), lambda i: (0, 0)),
                  pl.BlockSpec((1, F), lambda i: (0, 0)),
                  pl.BlockSpec((F, D), lambda i: (0, 0)),
                  pl.BlockSpec((1, D), lambda i: (0, 0))],
        out_specs=pl.BlockSpec((tm, D), lambda i: (i, 0)),
        compiler_params=_mosaic(("parallel",)),
    )(x, g.reshape(1, D), b.reshape(1, D), w1, b1.reshape(1, F), w2, b2.reshape(1, D))


def pallas_attention(qkv, n_head, d_head):
    """qkv: (B, S, 3*D) -> attention output (B, S, D); no host-side head transposes."""
    B, S, threeD = qkv.shape
    D = n_head * d_head
    scale = 1.0 / math.sqrt(d_head)
    return pl.pallas_call(
        functools.partial(attention_kernel, n_head=n_head, d_head=d_head, scale=scale),
        out_shape=jax.ShapeDtypeStruct((B, S, D), qkv.dtype),
        grid=(B,),
        in_specs=[pl.BlockSpec((1, S, threeD), lambda b: (b, 0, 0))],
        out_specs=pl.BlockSpec((1, S, D), lambda b: (b, 0, 0)),
        compiler_params=_mosaic(("parallel",)),
    )(qkv)


def pallas_cross_entropy(logits, labels, pad_idx):
    """Mean CE over labels != pad_idx (torch CrossEntropyLoss(ignore_index))."""
    N, V = logits.shape
    Np = ((N + 7) // 8) * 8                      # pad rows so they can be tiled
    if Np != N:
        logits = jnp.pad(logits, ((0, Np - N), (0, 0)))
        labels = jnp.pad(labels, ((0, Np - N),), constant_values=pad_idx)
    labels2 = labels.reshape(Np, 1).astype(jnp.int32)
    tr = _row_tile(Np, 256)
    s, c = pl.pallas_call(
        functools.partial(xent_kernel, pad_idx=pad_idx),
        out_shape=(jax.ShapeDtypeStruct((1, 1), jnp.float32),
                   jax.ShapeDtypeStruct((1, 1), jnp.float32)),
        grid=(Np // tr,),
        in_specs=[pl.BlockSpec((tr, V), lambda i: (i, 0)),
                  pl.BlockSpec((tr, 1), lambda i: (i, 0))],
        out_specs=(pl.BlockSpec((1, 1), lambda i: (0, 0)),
                   pl.BlockSpec((1, 1), lambda i: (0, 0))),
        scratch_shapes=[pltpu.VMEM((1, 1), jnp.float32),
                        pltpu.VMEM((1, 1), jnp.float32)],
        compiler_params=_mosaic(("arbitrary",)),
    )(logits, labels2)
    return s[0, 0] / jnp.maximum(c[0, 0], 1.0)   # guard all-ignored batches


# ----------------------------------------------------------------------------
# Model: parameters + forward
# ----------------------------------------------------------------------------

CONFIG = dict(
    n_embed=32,
    n_head=4,
    n_layer=2,
    n_positions=16,
    n_inner=128,          # 4 * n_embed
    vocab_size=64,
    num_labels=3,
    classification_head_bias=True,
    tie_weight=False,
    pad_idx=-100,
    lm_loss_weight=1.0,
    layer_norm_eps=1e-5,
)


def init_params(key, cfg):
    D, V, P, F, L = (cfg["n_embed"], cfg["vocab_size"], cfg["n_positions"],
                     cfg["n_inner"], cfg["n_layer"])
    std = 0.02
    keys = iter(jax.random.split(key, 8 + 8 * L))
    nrm = lambda shape: (std * jax.random.normal(next(keys), shape, jnp.float32)).astype(DTYPE)
    ones = lambda shape: jnp.ones(shape, DTYPE)
    zeros = lambda shape: jnp.zeros(shape, DTYPE)

    params = {
        "wte": nrm((V, D)),
        "wpe": nrm((P, D)),
        "ln_f_g": ones((D,)), "ln_f_b": zeros((D,)),
        "lm_head_w": nrm((D, V)),                       # (in, out); no bias
        "cls_w": nrm((D, cfg["num_labels"])),
        "cls_b": zeros((cfg["num_labels"],)),
        "blocks": [],
    }
    if cfg["tie_weight"]:
        params["lm_head_w"] = params["wte"].T           # forward-only weight tying
    for _ in range(L):
        blk = {
            "ln1_g": ones((D,)), "ln1_b": zeros((D,)),
            "w_attn": nrm((D, 3 * D)), "b_attn": zeros((3 * D,)),
            "w_proj": nrm((D, D)),     "b_proj": zeros((D,)),
            "ln2_g": ones((D,)), "ln2_b": zeros((D,)),
            "w_fc": nrm((D, F)),       "b_fc": zeros((F,)),
            "w_fc2": nrm((F, D)),      "b_fc2": zeros((D,)),
        }
        params["blocks"].append(blk)
    return params


def gpt2_block(blk, x2d, B, S, n_head, d_head, eps):
    D = n_head * d_head
    # (1) fused ln1 + QKV
    qkv = pallas_ln_matmul(x2d, blk["ln1_g"], blk["ln1_b"],
                           blk["w_attn"], blk["b_attn"], eps)          # (B*S, 3D)
    # (2) causal attention, all heads per batch element (no XLA transposes)
    attn = pallas_attention(qkv.reshape(B, S, 3 * D), n_head, d_head)  # (B, S, D)
    # (3) output proj + bias + residual
    x2d = pallas_matmul(attn.reshape(B * S, D), blk["w_proj"], blk["b_proj"],
                        residual=x2d)
    # (4) fused ln2 + MLP + residual
    x2d = pallas_ln_mlp_residual(x2d, blk["ln2_g"], blk["ln2_b"],
                                 blk["w_fc"], blk["b_fc"], blk["w_fc2"], blk["b_fc2"], eps)
    return x2d


def forward(params, cfg, input_ids, actual_seq_length,
            labels=None, classification_labels=None):
    """use_rmpad=False path of GPT2LMModelwClassificationHeadRMPAD.forward."""
    B, S = input_ids.shape
    D, H = cfg["n_embed"], cfg["n_head"]
    Dh = D // H
    V = cfg["vocab_size"]
    eps = cfg["layer_norm_eps"]
    pad_idx = cfg["pad_idx"]

    # --- GPT2Model: token + position embeddings ---
    # TODO(synk): move the wte/wpe row-gather into a Pallas kernel with scalar-prefetched ids.
    x = (jnp.take(params["wte"], input_ids, axis=0)
         + params["wpe"][None, :S, :]).astype(DTYPE)
    x2d = x.reshape(B * S, D)

    for blk in params["blocks"]:
        x2d = gpt2_block(blk, x2d, B, S, H, Dh, eps)

    # --- fused final LayerNorm + lm_head (no bias) ---
    hidden2d, lm_logits2d = pallas_ln_matmul_dual(
        x2d, params["ln_f_g"], params["ln_f_b"], params["lm_head_w"], eps)
    hidden = hidden2d.reshape(B, S, D)
    lm_logits = lm_logits2d.reshape(B, S, V)

    # --- eos gather + classification head (padded to 128 lanes for dense stores) ---
    eos_idx = actual_seq_length.astype(jnp.int32) - 1                           # (B,)
    eos_output = hidden[jnp.arange(B), eos_idx]                                 # (B, D)
    nl = cfg["num_labels"]
    nl_pad = ((nl + 127) // 128) * 128
    cls_w = jnp.zeros((D, nl_pad), DTYPE).at[:, :nl].set(params["cls_w"])
    cls_b = (jnp.zeros((nl_pad,), DTYPE).at[:nl].set(params["cls_b"])
             if cfg["classification_head_bias"] else None)
    classification_logits = pallas_matmul(eos_output, cls_w, cls_b)[:, :nl]     # (B, nl)

    lm_loss = jnp.float32(0.0)
    classification_loss = jnp.float32(0.0)
    if labels is not None:
        shift_logits = lm_logits[:, :-1, :].reshape(-1, V)
        shift_labels = labels[:, 1:].reshape(-1)
        # TODO(synk): when only the loss is needed, fuse lm_head with this reduction so the
        # (B*S, V) logits never round-trip HBM; kept separate because `logits` is returned.
        lm_loss = pallas_cross_entropy(shift_logits, shift_labels, pad_idx)
    if classification_labels is not None:
        classification_loss = pallas_cross_entropy(
            classification_logits, classification_labels.reshape(-1), pad_idx)

    loss = cfg["lm_loss_weight"] * lm_loss + classification_loss
    # TODO(synk): use_rmpad=True path (unpad index_select / pad_input, seq_lens, word_idx
    # bookkeeping) not implemented; non-rmpad path returns seq_lens=None as in HF.
    return {
        "loss": loss,
        "lm_loss": lm_loss,
        "classification_loss": classification_loss,
        "logits": lm_logits,
        "classification_logits": classification_logits,
        "seq_lens": None,
    }


# ----------------------------------------------------------------------------
# Example run
# ----------------------------------------------------------------------------

if __name__ == "__main__":
    cfg = CONFIG
    key = jax.random.PRNGKey(0)
    k_par, k_ids, k_cls = jax.random.split(key, 3)

    params = init_params(k_par, cfg)

    B, S = 2, 8
    input_ids = jax.random.randint(k_ids, (B, S), 0, cfg["vocab_size"], dtype=jnp.int32)
    actual_seq_length = jnp.array([8, 6], dtype=jnp.int32)

    # labels = input_ids with padding positions (beyond actual length) ignored
    seq_pos = jnp.arange(S, dtype=jnp.int32)[None, :]
    pad_mask = seq_pos >= actual_seq_length[:, None]
    labels = jnp.where(pad_mask, jnp.int32(cfg["pad_idx"]), input_ids)
    classification_labels = jax.random.randint(k_cls, (B,), 0, cfg["num_labels"],
                                               dtype=jnp.int32)

    # jit the whole forward: fuses the glue XLA ops and removes per-pallas_call dispatch
    # overhead, which dominates at these small shapes.
    @jax.jit
    def run(params, input_ids, actual_seq_length, labels, classification_labels):
        return forward(params, cfg, input_ids, actual_seq_length,
                       labels=labels, classification_labels=classification_labels)

    out = run(params, input_ids, actual_seq_length, labels, classification_labels)
    jax.block_until_ready(out["loss"])
    jax.block_until_ready(out["logits"])
    jax.block_until_ready(out["classification_logits"])
    assert out["logits"].shape == (B, S, cfg["vocab_size"])
    assert out["classification_logits"].shape == (B, cfg["num_labels"])
    assert bool(jnp.isfinite(out["loss"]))
    print("KERNEL_OK")
</pallas_src>

<mosaic_0001>
module attributes {stable_mosaic.version = 11 : i64} {
  func.func @attention_kernel(%arg0: i32, %arg1: memref<1x8x96xbf16, #tpu.memory_space<vmem>>, %arg2: memref<1x8x32xbf16, #tpu.memory_space<vmem>>) attributes {dimension_semantics = [#tpu.dimension_semantics<parallel>], iteration_bounds = array<i64: 2>, scalar_prefetch = 0 : i64, scratch_operands = 0 : i64, tpu.core_type = #tpu.core_type<tc>, window_params = [{transform_indices = @transform_0, window_bounds = array<i64: 1, 8, 96>}, {transform_indices = @transform_1, window_bounds = array<i64: 1, 8, 32>}]} {
    %c0 = arith.constant 0 : index
    %c0_0 = arith.constant 0 : index
    %c0_1 = arith.constant 0 : index
    %0 = vector.load %arg1[%c0, %c0_0, %c0_1] : memref<1x8x96xbf16, #tpu.memory_space<vmem>>, vector<1x8x96xbf16>
    %1 = vector.shape_cast %0 : vector<1x8x96xbf16> to vector<8x96xbf16>
    %2 = tpu.iota {dimensions = array<i32: 0>} : vector<8x8xi32>
    %3 = tpu.iota {dimensions = array<i32: 1>} : vector<8x8xi32>
    %4 = arith.cmpi sle, %3, %2 : vector<8x8xi32>
    %5 = vector.extract_strided_slice %1 {offsets = [0, 0], sizes = [8, 8], strides = [1, 1]} : vector<8x96xbf16> to vector<8x8xbf16>
    %6 = vector.extract_strided_slice %1 {offsets = [0, 32], sizes = [8, 8], strides = [1, 1]} : vector<8x96xbf16> to vector<8x8xbf16>
    %7 = vector.extract_strided_slice %1 {offsets = [0, 64], sizes = [8, 8], strides = [1, 1]} : vector<8x96xbf16> to vector<8x8xbf16>
    %cst = arith.constant dense<0.000000e+00> : vector<8x8xf32>
    %8 = tpu.matmul %5, %6, %cst {dimension_numbers = #tpu.dot_dimension_numbers<[1], [1], [0], [0], [0, 0, 1, 0], [], []>} : vector<8x8xbf16>, vector<8x8xbf16>, vector<8x8xf32> -> vector<8x8xf32>
    %cst_2 = arith.constant 0.353553385 : f32
    %9 = vector.broadcast %cst_2 : f32 to vector<8x8xf32>
    %10 = arith.mulf %8, %9 : vector<8x8xf32>
    %cst_3 = arith.constant -1.000000e+30 : f32
    %11 = vector.broadcast %cst_3 : f32 to vector<8x8xf32>
    %12 = arith.select %4, %10, %11 : vector<8x8xi1>, vector<8x8xf32>
    %cst_4 = arith.constant dense<0xFF800000> : vector<8xf32>
    %13 = vector.multi_reduction <maximumf>, %12, %cst_4 [1] : vector<8x8xf32> to vector<8xf32>
    %14 = vector.shape_cast %13 : vector<8xf32> to vector<8x1xf32>
    %15 = vector.broadcast %14 : vector<8x1xf32> to vector<8x8xf32>
    %16 = arith.subf %12, %15 : vector<8x8xf32>
    %17 = math.exp %16 : vector<8x8xf32>
    %cst_5 = arith.constant dense<0.000000e+00> : vector<8xf32>
    %18 = vector.multi_reduction <add>, %17, %cst_5 [1] : vector<8x8xf32> to vector<8xf32>
    %19 = vector.shape_cast %18 : vector<8xf32> to vector<8x1xf32>
    %20 = tpu.reciprocal %19 {approx = true} : vector<8x1xf32> -> vector<8x1xf32>
    %21 = vector.broadcast %20 : vector<8x1xf32> to vector<8x8xf32>
    %22 = arith.mulf %17, %21 : vector<8x8xf32>
    %23 = arith.truncf %22 : vector<8x8xf32> to vector<8x8xbf16>
    %cst_6 = arith.constant dense<0.000000e+00> : vector<8x8xf32>
    %24 = tpu.matmul %23, %7, %cst_6 {dimension_numbers = #tpu.dot_dimension_numbers<[1], [0], [0], [1], [0, 0, 1, 1], [], []>} : vector<8x8xbf16>, vector<8x8xbf16>, vector<8x8xf32> -> vector<8x8xf32>
    %25 = vector.extract_strided_slice %1 {offsets = [0, 8], sizes = [8, 8], strides = [1, 1]} : vector<8x96xbf16> to vector<8x8xbf16>
    %26 = vector.extract_strided_slice %1 {offsets = [0, 40], sizes = [8, 8], strides = [1, 1]} : vector<8x96xbf16> to vector<8x8xbf16>
    %27 = vector.extract_strided_slice %1 {offsets = [0, 72], sizes = [8, 8], strides = [1, 1]} : vector<8x96xbf16> to vector<8x8xbf16>
    %cst_7 = arith.constant dense<0.000000e+00> : vector<8x8xf32>
    %28 = tpu.matmul %25, %26, %cst_7 {dimension_numbers = #tpu.dot_dimension_numbers<[1], [1], [0], [0], [0, 0, 1, 0], [], []>} : vector<8x8xbf16>, vector<8x8xbf16>, vector<8x8xf32> -> vector<8x8xf32>
    %cst_8 = arith.constant 0.353553385 : f32
    %29 = vector.broadcast %cst_8 : f32 to vector<8x8xf32>
    %30 = arith.mulf %28, %29 : vector<8x8xf32>
    %cst_9 = arith.constant -1.000000e+30 : f32
    %31 = vector.broadcast %cst_9 : f32 to vector<8x8xf32>
    %32 = arith.select %4, %30, %31 : vector<8x8xi1>, vector<8x8xf32>
    %cst_10 = arith.constant dense<0xFF800000> : vector<8xf32>
    %33 = vector.multi_reduction <maximumf>, %32, %cst_10 [1] : vector<8x8xf32> to vector<8xf32>
    %34 = vector.shape_cast %33 : vector<8xf32> to vector<8x1xf32>
    %35 = vector.broadcast %34 : vector<8x1xf32> to vector<8x8xf32>
    %36 = arith.subf %32, %35 : vector<8x8xf32>
    %37 = math.exp %36 : vector<8x8xf32>
    %cst_11 = arith.constant dense<0.000000e+00> : vector<8xf32>
    %38 = vector.multi_reduction <add>, %37, %cst_11 [1] : vector<8x8xf32> to vector<8xf32>
    %39 = vector.shape_cast %38 : vector<8xf32> to vector<8x1xf32>
    %40 = tpu.reciprocal %39 {approx = true} : vector<8x1xf32> -> vector<8x1xf32>
    %41 = vector.broadcast %40 : vector<8x1xf32> to vector<8x8xf32>
    %42 = arith.mulf %37, %41 : vector<8x8xf32>
    %43 = arith.truncf %42 : vector<8x8xf32> to vector<8x8xbf16>
    %cst_12 = arith.constant dense<0.000000e+00> : vector<8x8xf32>
    %44 = tpu.matmul %43, %27, %cst_12 {dimension_numbers = #tpu.dot_dimension_numbers<[1], [0], [0], [1], [0, 0, 1, 1], [], []>} : vector<8x8xbf16>, vector<8x8xbf16>, vector<8x8xf32> -> vector<8x8xf32>
    %45 = vector.extract_strided_slice %1 {offsets = [0, 16], sizes = [8, 8], strides = [1, 1]} : vector<8x96xbf16> to vector<8x8xbf16>
    %46 = vector.extract_strided_slice %1 {offsets = [0, 48], sizes = [8, 8], strides = [1, 1]} : vector<8x96xbf16> to vector<8x8xbf16>
    %47 = vector.extract_strided_slice %1 {offsets = [0, 80], sizes = [8, 8], strides = [1, 1]} : vector<8x96xbf16> to vector<8x8xbf16>
    %cst_13 = arith.constant dense<0.000000e+00> : vector<8x8xf32>
    %48 = tpu.matmul %45, %46, %cst_13 {dimension_numbers = #tpu.dot_dimension_numbers<[1], [1], [0], [0], [0, 0, 1, 0], [], []>} : vector<8x8xbf16>, vector<8x8xbf16>, vector<8x8xf32> -> vector<8x8xf32>
    %cst_14 = arith.constant 0.353553385 : f32
    %49 = vector.broadcast %cst_14 : f32 to vector<8x8xf32>
    %50 = arith.mulf %48, %49 : vector<8x8xf32>
    %cst_15 = arith.constant -1.000000e+30 : f32
    %51 = vector.broadcast %cst_15 : f32 to vector<8x8xf32>
    %52 = arith.select %4, %50, %51 : vector<8x8xi1>, vector<8x8xf32>
    %cst_16 = arith.constant dense<0xFF800000> : vector<8xf32>
    %53 = vector.multi_reduction <maximumf>, %52, %cst_16 [1] : vector<8x8xf32> to vector<8xf32>
    %54 = vector.shape_cast %53 : vector<8xf32> to vector<8x1xf32>
    %55 = vector.broadcast %54 : vector<8x1xf32> to vector<8x8xf32>
    %56 = arith.subf %52, %55 : vector<8x8xf32>
    %57 = math.exp %56 : vector<8x8xf32>
    %cst_17 = arith.constant dense<0.000000e+00> : vector<8xf32>
    %58 = vector.multi_reduction <add>, %57, %cst_17 [1] : vector<8x8xf32> to vector<8xf32>
    %59 = vector.shape_cast %58 : vector<8xf32> to vector<8x1xf32>
    %60 = tpu.reciprocal %59 {approx = true} : vector<8x1xf32> -> vector<8x1xf32>
    %61 = vector.broadcast %60 : vector<8x1xf32> to vector<8x8xf32>
    %62 = arith.mulf %57, %61 : vector<8x8xf32>
    %63 = arith.truncf %62 : vector<8x8xf32> to vector<8x8xbf16>
    %cst_18 = arith.constant dense<0.000000e+00> : vector<8x8xf32>
    %64 = tpu.matmul %63, %47, %cst_18 {dimension_numbers = #tpu.dot_dimension_numbers<[1], [0], [0], [1], [0, 0, 1, 1], [], []>} : vector<8x8xbf16>, vector<8x8xbf16>, vector<8x8xf32> -> vector<8x8xf32>
    %65 = vector.extract_strided_slice %1 {offsets = [0, 24], sizes = [8, 8], strides = [1, 1]} : vector<8x96xbf16> to vector<8x8xbf16>
    %66 = vector.extract_strided_slice %1 {offsets = [0, 56], sizes = [8, 8], strides = [1, 1]} : vector<8x96xbf16> to vector<8x8xbf16>
    %67 = vector.extract_strided_slice %1 {offsets = [0, 88], sizes = [8, 8], strides = [1, 1]} : vector<8x96xbf16> to vector<8x8xbf16>
    %cst_19 = arith.constant dense<0.000000e+00> : vector<8x8xf32>
    %68 = tpu.matmul %65, %66, %cst_19 {dimension_numbers = #tpu.dot_dimension_numbers<[1], [1], [0], [0], [0, 0, 1, 0], [], []>} : vector<8x8xbf16>, vector<8x8xbf16>, vector<8x8xf32> -> vector<8x8xf32>
    %cst_20 = arith.constant 0.353553385 : f32
    %69 = vector.broadcast %cst_20 : f32 to vector<8x8xf32>
    %70 = arith.mulf %68, %69 : vector<8x8xf32>
    %cst_21 = arith.constant -1.000000e+30 : f32
    %71 = vector.broadcast %cst_21 : f32 to vector<8x8xf32>
    %72 = arith.select %4, %70, %71 : vector<8x8xi1>, vector<8x8xf32>
    %cst_22 = arith.constant dense<0xFF800000> : vector<8xf32>
    %73 = vector.multi_reduction <maximumf>, %72, %cst_22 [1] : vector<8x8xf32> to vector<8xf32>
    %74 = vector.shape_cast %73 : vector<8xf32> to vector<8x1xf32>
    %75 = vector.broadcast %74 : vector<8x1xf32> to vector<8x8xf32>
    %76 = arith.subf %72, %75 : vector<8x8xf32>
    %77 = math.exp %76 : vector<8x8xf32>
    %cst_23 = arith.constant dense<0.000000e+00> : vector<8xf32>
    %78 = vector.multi_reduction <add>, %77, %cst_23 [1] : vector<8x8xf32> to vector<8xf32>
    %79 = vector.shape_cast %78 : vector<8xf32> to vector<8x1xf32>
    %80 = tpu.reciprocal %79 {approx = true} : vector<8x1xf32> -> vector<8x1xf32>
    %81 = vector.broadcast %80 : vector<8x1xf32> to vector<8x8xf32>
    %82 = arith.mulf %77, %81 : vector<8x8xf32>
    %83 = arith.truncf %82 : vector<8x8xf32> to vector<8x8xbf16>
    %cst_24 = arith.constant dense<0.000000e+00> : vector<8x8xf32>
    %84 = tpu.matmul %83, %67, %cst_24 {dimension_numbers = #tpu.dot_dimension_numbers<[1], [0], [0], [1], [0, 0, 1, 1], [], []>} : vector<8x8xbf16>, vector<8x8xbf16>, vector<8x8xf32> -> vector<8x8xf32>
    %85 = tpu.concatenate %24, %44, %64, %84 in 1 : vector<8x8xf32>, vector<8x8xf32>, vector<8x8xf32>, vector<8x8xf32> -> vector<8x32xf32>
    %86 = arith.truncf %85 : vector<8x32xf32> to vector<8x32xbf16>
    %c0_25 = arith.constant 0 : index
    %c0_26 = arith.constant 0 : index
    %c0_27 = arith.constant 0 : index
    %87 = vector.load %arg2[%c0_25, %c0_26, %c0_27] : memref<1x8x32xbf16, #tpu.memory_space<vmem>>, vector<1x8x32xbf16>
    %88 = vector.shape_cast %87 : vector<1x8x32xbf16> to vector<8x32xbf16>
    %89 = vector.shape_cast %86 : vector<8x32xbf16> to vector<1x8x32xbf16>
    tpu.vector_store %arg2[%c0_25, %c0_26, %c0_27], %89 {strides = array<i32>} : memref<1x8x32xbf16, #tpu.memory_space<vmem>>, vector<1x8x32xbf16>,
    return
  }
  func.func @transform_0(%arg0: i32) -> (i32, i32, i32) {
    %c0_i32 = arith.constant 0 : i32
    %c0_i32_0 = arith.constant 0 : i32
    %c0_i32_1 = arith.constant 0 : i32
    return %arg0, %c0_i32, %c0_i32_0 : i32, i32, i32
  }
  func.func @transform_1(%arg0: i32) -> (i32, i32, i32) {
    %c0_i32 = arith.constant 0 : i32
    %c0_i32_0 = arith.constant 0 : i32
    %c0_i32_1 = arith.constant 0 : i32
    return %arg0, %c0_i32, %c0_i32_0 : i32, i32, i32
  }
}

module attributes {stable_mosaic.version = 11 : i64} {
  func.func @matmul_bias_residual_kernel(%arg0: i32, %arg1: i32, %arg2: i32, %arg3: memref<16x32xbf16, #tpu.memory_space<vmem>>, %arg4: memref<32x32xbf16, #tpu.memory_space<vmem>>, %arg5: memref<1x32xbf16, #tpu.memory_space<vmem>>, %arg6: memref<16x32xbf16, #tpu.memory_space<vmem>>, %arg7: memref<16x32xbf16, #tpu.memory_space<vmem>>, %arg8: memref<16x32xf32, #tpu.memory_space<vmem>>) attributes {dimension_semantics = [#tpu.dimension_semantics<parallel>, #tpu.dimension_semantics<parallel>, #tpu.dimension_semantics<arbitrary>], iteration_bounds = array<i64: 1, 1, 1>, scalar_prefetch = 0 : i64, scratch_operands = 1 : i64, tpu.core_type = #tpu.core_type<tc>, window_params = [{transform_indices = @transform_0, window_bounds = array<i64: 16, 32>}, {transform_indices = @transform_1, window_bounds = array<i64: 32, 32>}, {transform_indices = @transform_2, window_bounds = array<i64: 1, 32>}, {transform_indices = @transform_3, window_bounds = array<i64: 16, 32>}, {transform_indices = @transform_4, window_bounds = array<i64: 16, 32>}]} {
    %c0_i32 = arith.constant 0 : i32
    %0 = arith.cmpi eq, %arg2, %c0_i32 : i32
    %1 = arith.extui %0 : i1 to i32
    %c0_i32_0 = arith.constant 0 : i32
    %2 = arith.cmpi ne, %1, %c0_i32_0 : i32
    scf.if %2 {
      %cst_10 = arith.constant 0.000000e+00 : f32
      %12 = vector.broadcast %cst_10 : f32 to vector<16x32xf32>
      %c0_11 = arith.constant 0 : index
      %c0_12 = arith.constant 0 : index
      %13 = vector.load %arg8[%c0_11, %c0_12] : memref<16x32xf32, #tpu.memory_space<vmem>>, vector<16x32xf32>
      tpu.vector_store %arg8[%c0_11, %c0_12], %12 {strides = array<i32>} : memref<16x32xf32, #tpu.memory_space<vmem>>, vector<16x32xf32>,
    } else {
    }
    %c0 = arith.constant 0 : index
    %c0_1 = arith.constant 0 : index
    %3 = vector.load %arg8[%c0, %c0_1] : memref<16x32xf32, #tpu.memory_space<vmem>>, vector<16x32xf32>
    %c0_2 = arith.constant 0 : index
    %c0_3 = arith.constant 0 : index
    %4 = vector.load %arg3[%c0_2, %c0_3] : memref<16x32xbf16, #tpu.memory_space<vmem>>, vector<16x32xbf16>
    %c0_4 = arith.constant 0 : index
    %c0_5 = arith.constant 0 : index
    %5 = vector.load %arg4[%c0_4, %c0_5] : memref<32x32xbf16, #tpu.memory_space<vmem>>, vector<32x32xbf16>
    %cst = arith.constant dense<0.000000e+00> : vector<16x32xf32>
    %6 = tpu.matmul %4, %5, %cst {dimension_numbers = #tpu.dot_dimension_numbers<[1], [0], [0], [1], [0, 0, 1, 1], [], []>} : vector<16x32xbf16>, vector<32x32xbf16>, vector<16x32xf32> -> vector<16x32xf32>
    %7 = arith.addf %3, %6 : vector<16x32xf32>
    %c0_6 = arith.constant 0 : index
    %c0_7 = arith.constant 0 : index
    %8 = vector.load %arg8[%c0_6, %c0_7] : memref<16x32xf32, #tpu.memory_space<vmem>>, vector<16x32xf32>
    tpu.vector_store %arg8[%c0_6, %c0_7], %7 {strides = array<i32>} : memref<16x32xf32, #tpu.memory_space<vmem>>, vector<16x32xf32>,
    %c0_i32_8 = arith.constant 0 : i32
    %9 = arith.cmpi eq, %arg2, %c0_i32_8 : i32
    %10 = arith.extui %9 : i1 to i32
    %c0_i32_9 = arith.constant 0 : i32
    %11 = arith.cmpi ne, %10, %c0_i32_9 : i32
    scf.if %11 {
      %c0_10 = arith.constant 0 : index
      %c0_11 = arith.constant 0 : index
      %12 = vector.load %arg8[%c0_10, %c0_11] : memref<16x32xf32, #tpu.memory_space<vmem>>, vector<16x32xf32>
      %c0_12 = arith.constant 0 : index
      %c0_13 = arith.constant 0 : index
      %13 = vector.load %arg5[%c0_12, %c0_13] : memref<1x32xbf16, #tpu.memory_space<vmem>>, vector<1x32xbf16>
      %14 = arith.extf %13 : vector<1x32xbf16> to vector<1x32xf32>
      %15 = vector.broadcast %14 : vector<1x32xf32> to vector<16x32xf32>
      %16 = arith.addf %12, %15 : vector<16x32xf32>
      %c0_14 = arith.constant 0 : index
      %c0_15 = arith.constant 0 : index
      %17 = vector.load %arg6[%c0_14, %c0_15] : memref<16x32xbf16, #tpu.memory_space<vmem>>, vector<16x32xbf16>
      %18 = arith.extf %17 : vector<16x32xbf16> to vector<16x32xf32>
      %19 = arith.addf %16, %18 : vector<16x32xf32>
      %20 = arith.truncf %19 : vector<16x32xf32> to vector<16x32xbf16>
      %c0_16 = arith.constant 0 : index
      %c0_17 = arith.constant 0 : index
      %21 = vector.load %arg7[%c0_16, %c0_17] : memref<16x32xbf16, #tpu.memory_space<vmem>>, vector<16x32xbf16>
      tpu.vector_store %arg7[%c0_16, %c0_17], %20 {strides = array<i32>} : memref<16x32xbf16, #tpu.memory_space<vmem>>, vector<16x32xbf16>,
    } else {
    }
    return
  }
  func.func @transform_0(%arg0: i32, %arg1: i32, %arg2: i32) -> (i32, i32) {
    %c0_i32 = arith.constant 0 : i32
    return %arg0, %arg2 : i32, i32
  }
  func.func @transform_1(%arg0: i32, %arg1: i32, %arg2: i32) -> (i32, i32) {
    %c0_i32 = arith.constant 0 : i32
    return %arg2, %arg1 : i32, i32
  }
  func.func @transform_2(%arg0: i32, %arg1: i32, %arg2: i32) -> (i32, i32) {
    %c0_i32 = arith.constant 0 : i32
    %c0_i32_0 = arith.constant 0 : i32
    return %c0_i32, %arg1 : i32, i32
  }
  func.func @transform_3(%arg0: i32, %arg1: i32, %arg2: i32) -> (i32, i32) {
    %c0_i32 = arith.constant 0 : i32
    return %arg0, %arg1 : i32, i32
  }
  func.func @transform_4(%arg0: i32, %arg1: i32, %arg2: i32) -> (i32, i32) {
    %c0_i32 = arith.constant 0 : i32
    return %arg0, %arg1 : i32, i32
  }
}

module attributes {stable_mosaic.version = 11 : i64} {
  func.func @ln_matmul_bias_kernel(%arg0: i32, %arg1: i32, %arg2: memref<16x32xbf16, #tpu.memory_space<vmem>>, %arg3: memref<1x32xbf16, #tpu.memory_space<vmem>>, %arg4: memref<1x32xbf16, #tpu.memory_space<vmem>>, %arg5: memref<32x96xbf16, #tpu.memory_space<vmem>>, %arg6: memref<1x96xbf16, #tpu.memory_space<vmem>>, %arg7: memref<16x96xbf16, #tpu.memory_space<vmem>>) attributes {dimension_semantics = [#tpu.dimension_semantics<parallel>, #tpu.dimension_semantics<parallel>], iteration_bounds = array<i64: 1, 1>, scalar_prefetch = 0 : i64, scratch_operands = 0 : i64, tpu.core_type = #tpu.core_type<tc>, window_params = [{transform_indices = @transform_0, window_bounds = array<i64: 16, 32>}, {pipeline_mode = #tpu.pipeline_mode<synchronous>, transform_indices = @transform_1, window_bounds = array<i64: 1, 32>}, {pipeline_mode = #tpu.pipeline_mode<synchronous>, transform_indices = @transform_2, window_bounds = array<i64: 1, 32>}, {transform_indices = @transform_3, window_bounds = array<i64: 32, 96>}, {transform_indices = @transform_4, window_bounds = array<i64: 1, 96>}, {transform_indices = @transform_5, window_bounds = array<i64: 16, 96>}]} {
    %c0 = arith.constant 0 : index
    %c0_0 = arith.constant 0 : index
    %0 = vector.load %arg2[%c0, %c0_0] : memref<16x32xbf16, #tpu.memory_space<vmem>>, vector<16x32xbf16>
    %1 = arith.extf %0 : vector<16x32xbf16> to vector<16x32xf32>
    %c0_1 = arith.constant 0 : index
    %c0_2 = arith.constant 0 : index
    %2 = vector.load %arg3[%c0_1, %c0_2] : memref<1x32xbf16, #tpu.memory_space<vmem>>, vector<1x32xbf16>
    %3 = arith.extf %2 : vector<1x32xbf16> to vector<1x32xf32>
    %c0_3 = arith.constant 0 : index
    %c0_4 = arith.constant 0 : index
    %4 = vector.load %arg4[%c0_3, %c0_4] : memref<1x32xbf16, #tpu.memory_space<vmem>>, vector<1x32xbf16>
    %5 = arith.extf %4 : vector<1x32xbf16> to vector<1x32xf32>
    %cst = arith.constant dense<0.000000e+00> : vector<16xf32>
    %6 = vector.multi_reduction <add>, %1, %cst [1] : vector<16x32xf32> to vector<16xf32>
    %7 = vector.shape_cast %6 : vector<16xf32> to vector<16x1xf32>
    %cst_5 = arith.constant 3.200000e+01 : f32
    %8 = vector.broadcast %cst_5 : f32 to vector<16x1xf32>
    %9 = arith.divf %7, %8 : vector<16x1xf32>
    %10 = vector.broadcast %9 : vector<16x1xf32> to vector<16x32xf32>
    %11 = arith.subf %1, %10 : vector<16x32xf32>
    %12 = arith.mulf %11, %11 : vector<16x32xf32>
    %cst_6 = arith.constant dense<0.000000e+00> : vector<16xf32>
    %13 = vector.multi_reduction <add>, %12, %cst_6 [1] : vector<16x32xf32> to vector<16xf32>
    %14 = vector.shape_cast %13 : vector<16xf32> to vector<16x1xf32>
    %cst_7 = arith.constant 3.200000e+01 : f32
    %15 = vector.broadcast %cst_7 : f32 to vector<16x1xf32>
    %16 = arith.divf %14, %15 : vector<16x1xf32>
    %17 = vector.broadcast %9 : vector<16x1xf32> to vector<16x32xf32>
    %18 = arith.subf %1, %17 : vector<16x32xf32>
    %cst_8 = arith.constant 9.99999974E-6 : f32
    %19 = vector.broadcast %cst_8 : f32 to vector<16x1xf32>
    %20 = arith.addf %16, %19 : vector<16x1xf32>
    %21 = math.rsqrt %20 : vector<16x1xf32>
    %22 = vector.broadcast %21 : vector<16x1xf32> to vector<16x32xf32>
    %23 = arith.mulf %18, %22 : vector<16x32xf32>
    %24 = vector.broadcast %3 : vector<1x32xf32> to vector<16x32xf32>
    %25 = arith.mulf %23, %24 : vector<16x32xf32>
    %26 = vector.broadcast %5 : vector<1x32xf32> to vector<16x32xf32>
    %27 = arith.addf %25, %26 : vector<16x32xf32>
    %28 = arith.truncf %27 : vector<16x32xf32> to vector<16x32xbf16>
    %c0_9 = arith.constant 0 : index
    %c0_10 = arith.constant 0 : index
    %29 = vector.load %arg5[%c0_9, %c0_10] : memref<32x96xbf16, #tpu.memory_space<vmem>>, vector<32x96xbf16>
    %cst_11 = arith.constant dense<0.000000e+00> : vector<16x96xf32>
    %30 = tpu.matmul %28, %29, %cst_11 {dimension_numbers = #tpu.dot_dimension_numbers<[1], [0], [0], [1], [0, 0, 1, 1], [], []>} : vector<16x32xbf16>, vector<32x96xbf16>, vector<16x96xf32> -> vector<16x96xf32>
    %c0_12 = arith.constant 0 : index
    %c0_13 = arith.constant 0 : index
    %31 = vector.load %arg6[%c0_12, %c0_13] : memref<1x96xbf16, #tpu.memory_space<vmem>>, vector<1x96xbf16>
    %32 = arith.extf %31 : vector<1x96xbf16> to vector<1x96xf32>
    %33 = vector.broadcast %32 : vector<1x96xf32> to vector<16x96xf32>
    %34 = arith.addf %30, %33 : vector<16x96xf32>
    %35 = arith.truncf %34 : vector<16x96xf32> to vector<16x96xbf16>
    %c0_14 = arith.constant 0 : index
    %c0_15 = arith.constant 0 : index
    %36 = vector.load %arg7[%c0_14, %c0_15] : memref<16x96xbf16, #tpu.memory_space<vmem>>, vector<16x96xbf16>
    tpu.vector_store %arg7[%c0_14, %c0_15], %35 {strides = array<i32>} : memref<16x96xbf16, #tpu.memory_space<vmem>>, vector<16x96xbf16>,
    return
  }
  func.func @transform_0(%arg0: i32, %arg1: i32) -> (i32, i32) {
    %c0_i32 = arith.constant 0 : i32
    %c0_i32_0 = arith.constant 0 : i32
    return %arg0, %c0_i32 : i32, i32
  }
  func.func @transform_1(%arg0: i32, %arg1: i32) -> (i32, i32) {
    %c0_i32 = arith.constant 0 : i32
    %c0_i32_0 = arith.constant 0 : i32
    %c0_i32_1 = arith.constant 0 : i32
    return %c0_i32, %c0_i32_0 : i32, i32
  }
  func.func @transform_2(%arg0: i32, %arg1: i32) -> (i32, i32) {
    %c0_i32 = arith.constant 0 : i32
    %c0_i32_0 = arith.constant 0 : i32
    %c0_i32_1 = arith.constant 0 : i32
    return %c0_i32, %c0_i32_0 : i32, i32
  }
  func.func @transform_3(%arg0: i32, %arg1: i32) -> (i32, i32) {
    %c0_i32 = arith.constant 0 : i32
    %c0_i32_0 = arith.constant 0 : i32
    return %c0_i32, %arg1 : i32, i32
  }
  func.func @transform_4(%arg0: i32, %arg1: i32) -> (i32, i32) {
    %c0_i32 = arith.constant 0 : i32
    %c0_i32_0 = arith.constant 0 : i32
    return %c0_i32, %arg1 : i32, i32
  }
  func.func @transform_5(%arg0: i32, %arg1: i32) -> (i32, i32) {
    %c0_i32 = arith.constant 0 : i32
    return %arg0, %arg1 : i32, i32
  }
}

module attributes {stable_mosaic.version = 11 : i64} {
  func.func @ln_mlp_residual_kernel(%arg0: i32, %arg1: memref<16x32xbf16, #tpu.memory_space<vmem>>, %arg2: memref<1x32xbf16, #tpu.memory_space<vmem>>, %arg3: memref<1x32xbf16, #tpu.memory_space<vmem>>, %arg4: memref<32x128xbf16, #tpu.memory_space<vmem>>, %arg5: memref<1x128xbf16, #tpu.memory_space<vmem>>, %arg6: memref<128x32xbf16, #tpu.memory_space<vmem>>, %arg7: memref<1x32xbf16, #tpu.memory_space<vmem>>, %arg8: memref<16x32xbf16, #tpu.memory_space<vmem>>) attributes {dimension_semantics = [#tpu.dimension_semantics<parallel>], iteration_bounds = array<i64: 1>, scalar_prefetch = 0 : i64, scratch_operands = 0 : i64, tpu.core_type = #tpu.core_type<tc>, window_params = [{transform_indices = @transform_0, window_bounds = array<i64: 16, 32>}, {pipeline_mode = #tpu.pipeline_mode<synchronous>, transform_indices = @transform_1, window_bounds = array<i64: 1, 32>}, {pipeline_mode = #tpu.pipeline_mode<synchronous>, transform_indices = @transform_2, window_bounds = array<i64: 1, 32>}, {pipeline_mode = #tpu.pipeline_mode<synchronous>, transform_indices = @transform_3, window_bounds = array<i64: 32, 128>}, {pipeline_mode = #tpu.pipeline_mode<synchronous>, transform_indices = @transform_4, window_bounds = array<i64: 1, 128>}, {pipeline_mode = #tpu.pipeline_mode<synchronous>, transform_indices = @transform_5, window_bounds = array<i64: 128, 32>}, {pipeline_mode = #tpu.pipeline_mode<synchronous>, transform_indices = @transform_6, window_bounds = array<i64: 1, 32>}, {transform_indices = @transform_7, window_bounds = array<i64: 16, 32>}]} {
    %c0 = arith.constant 0 : index
    %c0_0 = arith.constant 0 : index
    %0 = vector.load %arg1[%c0, %c0_0] : memref<16x32xbf16, #tpu.memory_space<vmem>>, vector<16x32xbf16>
    %1 = arith.extf %0 : vector<16x32xbf16> to vector<16x32xf32>
    %c0_1 = arith.constant 0 : index
    %c0_2 = arith.constant 0 : index
    %2 = vector.load %arg2[%c0_1, %c0_2] : memref<1x32xbf16, #tpu.memory_space<vmem>>, vector<1x32xbf16>
    %3 = arith.extf %2 : vector<1x32xbf16> to vector<1x32xf32>
    %c0_3 = arith.constant 0 : index
    %c0_4 = arith.constant 0 : index
    %4 = vector.load %arg3[%c0_3, %c0_4] : memref<1x32xbf16, #tpu.memory_space<vmem>>, vector<1x32xbf16>
    %5 = arith.extf %4 : vector<1x32xbf16> to vector<1x32xf32>
    %cst = arith.constant dense<0.000000e+00> : vector<16xf32>
    %6 = vector.multi_reduction <add>, %1, %cst [1] : vector<16x32xf32> to vector<16xf32>
    %7 = vector.shape_cast %6 : vector<16xf32> to vector<16x1xf32>
    %cst_5 = arith.constant 3.200000e+01 : f32
    %8 = vector.broadcast %cst_5 : f32 to vector<16x1xf32>
    %9 = arith.divf %7, %8 : vector<16x1xf32>
    %10 = vector.broadcast %9 : vector<16x1xf32> to vector<16x32xf32>
    %11 = arith.subf %1, %10 : vector<16x32xf32>
    %12 = arith.mulf %11, %11 : vector<16x32xf32>
    %cst_6 = arith.constant dense<0.000000e+00> : vector<16xf32>
    %13 = vector.multi_reduction <add>, %12, %cst_6 [1] : vector<16x32xf32> to vector<16xf32>
    %14 = vector.shape_cast %13 : vector<16xf32> to vector<16x1xf32>
    %cst_7 = arith.constant 3.200000e+01 : f32
    %15 = vector.broadcast %cst_7 : f32 to vector<16x1xf32>
    %16 = arith.divf %14, %15 : vector<16x1xf32>
    %17 = vector.broadcast %9 : vector<16x1xf32> to vector<16x32xf32>
    %18 = arith.subf %1, %17 : vector<16x32xf32>
    %cst_8 = arith.constant 9.99999974E-6 : f32
    %19 = vector.broadcast %cst_8 : f32 to vector<16x1xf32>
    %20 = arith.addf %16, %19 : vector<16x1xf32>
    %21 = math.rsqrt %20 : vector<16x1xf32>
    %22 = vector.broadcast %21 : vector<16x1xf32> to vector<16x32xf32>
    %23 = arith.mulf %18, %22 : vector<16x32xf32>
    %24 = vector.broadcast %3 : vector<1x32xf32> to vector<16x32xf32>
    %25 = arith.mulf %23, %24 : vector<16x32xf32>
    %26 = vector.broadcast %5 : vector<1x32xf32> to vector<16x32xf32>
    %27 = arith.addf %25, %26 : vector<16x32xf32>
    %28 = arith.truncf %27 : vector<16x32xf32> to vector<16x32xbf16>
    %c0_9 = arith.constant 0 : index
    %c0_10 = arith.constant 0 : index
    %29 = vector.load %arg4[%c0_9, %c0_10] : memref<32x128xbf16, #tpu.memory_space<vmem>>, vector<32x128xbf16>
    %cst_11 = arith.constant dense<0.000000e+00> : vector<16x128xf32>
    %30 = tpu.matmul %28, %29, %cst_11 {dimension_numbers = #tpu.dot_dimension_numbers<[1], [0], [0], [1], [0, 0, 1, 1], [], []>} : vector<16x32xbf16>, vector<32x128xbf16>, vector<16x128xf32> -> vector<16x128xf32>
    %c0_12 = arith.constant 0 : index
    %c0_13 = arith.constant 0 : index
    %31 = vector.load %arg5[%c0_12, %c0_13] : memref<1x128xbf16, #tpu.memory_space<vmem>>, vector<1x128xbf16>
    %32 = arith.extf %31 : vector<1x128xbf16> to vector<1x128xf32>
    %33 = vector.broadcast %32 : vector<1x128xf32> to vector<16x128xf32>
    %34 = arith.addf %30, %33 : vector<16x128xf32>
    %cst_14 = arith.constant 5.000000e-01 : f32
    %35 = vector.broadcast %cst_14 : f32 to vector<16x128xf32>
    %36 = arith.mulf %35, %34 : vector<16x128xf32>
    %cst_15 = arith.constant 4.471500e-02 : f32
    %37 = vector.broadcast %cst_15 : f32 to vector<16x128xf32>
    %38 = arith.mulf %37, %34 : vector<16x128xf32>
    %39 = arith.mulf %38, %34 : vector<16x128xf32>
    %40 = arith.mulf %39, %34 : vector<16x128xf32>
    %41 = arith.addf %34, %40 : vector<16x128xf32>
    %cst_16 = arith.constant 0.797884583 : f32
    %42 = vector.broadcast %cst_16 : f32 to vector<16x128xf32>
    %43 = arith.mulf %42, %41 : vector<16x128xf32>
    %44 = math.tanh %43 : vector<16x128xf32>
    %cst_17 = arith.constant 1.000000e+00 : f32
    %45 = vector.broadcast %cst_17 : f32 to vector<16x128xf32>
    %46 = arith.addf %45, %44 : vector<16x128xf32>
    %47 = arith.mulf %36, %46 : vector<16x128xf32>
    %48 = arith.truncf %47 : vector<16x128xf32> to vector<16x128xbf16>
    %c0_18 = arith.constant 0 : index
    %c0_19 = arith.constant 0 : index
    %49 = vector.load %arg6[%c0_18, %c0_19] : memref<128x32xbf16, #tpu.memory_space<vmem>>, vector<128x32xbf16>
    %cst_20 = arith.constant dense<0.000000e+00> : vector<16x32xf32>
    %50 = tpu.matmul %48, %49, %cst_20 {dimension_numbers = #tpu.dot_dimension_numbers<[1], [0], [0], [1], [0, 0, 1, 1], [], []>} : vector<16x128xbf16>, vector<128x32xbf16>, vector<16x32xf32> -> vector<16x32xf32>
    %c0_21 = arith.constant 0 : index
    %c0_22 = arith.constant 0 : index
    %51 = vector.load %arg7[%c0_21, %c0_22] : memref<1x32xbf16, #tpu.memory_space<vmem>>, vector<1x32xbf16>
    %52 = arith.extf %51 : vector<1x32xbf16> to vector<1x32xf32>
    %53 = vector.broadcast %52 : vector<1x32xf32> to vector<16x32xf32>
    %54 = arith.addf %50, %53 : vector<16x32xf32>
    %55 = arith.addf %54, %1 : vector<16x32xf32>
    %56 = arith.truncf %55 : vector<16x32xf32> to vector<16x32xbf16>
    %c0_23 = arith.constant 0 : index
    %c0_24 = arith.constant 0 : index
    %57 = vector.load %arg8[%c0_23, %c0_24] : memref<16x32xbf16, #tpu.memory_space<vmem>>, vector<16x32xbf16>
    tpu.vector_store %arg8[%c0_23, %c0_24], %56 {strides = array<i32>} : memref<16x32xbf16, #tpu.memory_space<vmem>>, vector<16x32xbf16>,
    return
  }
  func.func @transform_0(%arg0: i32) -> (i32, i32) {
    %c0_i32 = arith.constant 0 : i32
    %c0_i32_0 = arith.constant 0 : i32
    return %arg0, %c0_i32 : i32, i32
  }
  func.func @transform_1(%arg0: i32) -> (i32, i32) {
    %c0_i32 = arith.constant 0 : i32
    %c0_i32_0 = arith.constant 0 : i32
    %c0_i32_1 = arith.constant 0 : i32
    return %c0_i32, %c0_i32_0 : i32, i32
  }
  func.func @transform_2(%arg0: i32) -> (i32, i32) {
    %c0_i32 = arith.constant 0 : i32
    %c0_i32_0 = arith.constant 0 : i32
    %c0_i32_1 = arith.constant 0 : i32
    return %c0_i32, %c0_i32_0 : i32, i32
  }
  func.func @transform_3(%arg0: i32) -> (i32, i32) {
    %c0_i32 = arith.constant 0 : i32
    %c0_i32_0 = arith.constant 0 : i32
    %c0_i32_1 = arith.constant 0 : i32
    return %c0_i32, %c0_i32_0 : i32, i32
  }
  func.func @transform_4(%arg0: i32) -> (i32, i32) {
    %c0_i32 = arith.constant 0 : i32
    %c0_i32_0 = arith.constant 0 : i32
    %c0_i32_1 = arith.constant 0 : i32
    return %c0_i32, %c0_i32_0 : i32, i32
  }
  func.func @transform_5(%arg0: i32) -> (i32, i32) {
    %c0_i32 = arith.constant 0 : i32
    %c0_i32_0 = arith.constant 0 : i32
    %c0_i32_1 = arith.constant 0 : i32
    return %c0_i32, %c0_i32_0 : i32, i32
  }
  func.func @transform_6(%arg0: i32) -> (i32, i32) {
    %c0_i32 = arith.constant 0 : i32
    %c0_i32_0 = arith.constant 0 : i32
    %c0_i32_1 = arith.constant 0 : i32
    return %c0_i32, %c0_i32_0 : i32, i32
  }
  func.func @transform_7(%arg0: i32) -> (i32, i32) {
    %c0_i32 = arith.constant 0 : i32
    %c0_i32_0 = arith.constant 0 : i32
    return %arg0, %c0_i32 : i32, i32
  }
}

module attributes {stable_mosaic.version = 11 : i64} {
  func.func @ln_matmul_dual_kernel(%arg0: i32, %arg1: i32, %arg2: memref<16x32xbf16, #tpu.memory_space<vmem>>, %arg3: memref<1x32xbf16, #tpu.memory_space<vmem>>, %arg4: memref<1x32xbf16, #tpu.memory_space<vmem>>, %arg5: memref<32x64xbf16, #tpu.memory_space<vmem>>, %arg6: memref<16x32xbf16, #tpu.memory_space<vmem>>, %arg7: memref<16x64xbf16, #tpu.memory_space<vmem>>) attributes {dimension_semantics = [#tpu.dimension_semantics<parallel>, #tpu.dimension_semantics<arbitrary>], iteration_bounds = array<i64: 1, 1>, scalar_prefetch = 0 : i64, scratch_operands = 0 : i64, tpu.core_type = #tpu.core_type<tc>, window_params = [{transform_indices = @transform_0, window_bounds = array<i64: 16, 32>}, {pipeline_mode = #tpu.pipeline_mode<synchronous>, transform_indices = @transform_1, window_bounds = array<i64: 1, 32>}, {pipeline_mode = #tpu.pipeline_mode<synchronous>, transform_indices = @transform_2, window_bounds = array<i64: 1, 32>}, {transform_indices = @transform_3, window_bounds = array<i64: 32, 64>}, {transform_indices = @transform_4, window_bounds = array<i64: 16, 32>}, {transform_indices = @transform_5, window_bounds = array<i64: 16, 64>}]} {
    %c0 = arith.constant 0 : index
    %c0_0 = arith.constant 0 : index
    %0 = vector.load %arg2[%c0, %c0_0] : memref<16x32xbf16, #tpu.memory_space<vmem>>, vector<16x32xbf16>
    %1 = arith.extf %0 : vector<16x32xbf16> to vector<16x32xf32>
    %c0_1 = arith.constant 0 : index
    %c0_2 = arith.constant 0 : index
    %2 = vector.load %arg3[%c0_1, %c0_2] : memref<1x32xbf16, #tpu.memory_space<vmem>>, vector<1x32xbf16>
    %3 = arith.extf %2 : vector<1x32xbf16> to vector<1x32xf32>
    %c0_3 = arith.constant 0 : index
    %c0_4 = arith.constant 0 : index
    %4 = vector.load %arg4[%c0_3, %c0_4] : memref<1x32xbf16, #tpu.memory_space<vmem>>, vector<1x32xbf16>
    %5 = arith.extf %4 : vector<1x32xbf16> to vector<1x32xf32>
    %cst = arith.constant dense<0.000000e+00> : vector<16xf32>
    %6 = vector.multi_reduction <add>, %1, %cst [1] : vector<16x32xf32> to vector<16xf32>
    %7 = vector.shape_cast %6 : vector<16xf32> to vector<16x1xf32>
    %cst_5 = arith.constant 3.200000e+01 : f32
    %8 = vector.broadcast %cst_5 : f32 to vector<16x1xf32>
    %9 = arith.divf %7, %8 : vector<16x1xf32>
    %10 = vector.broadcast %9 : vector<16x1xf32> to vector<16x32xf32>
    %11 = arith.subf %1, %10 : vector<16x32xf32>
    %12 = arith.mulf %11, %11 : vector<16x32xf32>
    %cst_6 = arith.constant dense<0.000000e+00> : vector<16xf32>
    %13 = vector.multi_reduction <add>, %12, %cst_6 [1] : vector<16x32xf32> to vector<16xf32>
    %14 = vector.shape_cast %13 : vector<16xf32> to vector<16x1xf32>
    %cst_7 = arith.constant 3.200000e+01 : f32
    %15 = vector.broadcast %cst_7 : f32 to vector<16x1xf32>
    %16 = arith.divf %14, %15 : vector<16x1xf32>
    %17 = vector.broadcast %9 : vector<16x1xf32> to vector<16x32xf32>
    %18 = arith.subf %1, %17 : vector<16x32xf32>
    %cst_8 = arith.constant 9.99999974E-6 : f32
    %19 = vector.broadcast %cst_8 : f32 to vector<16x1xf32>
    %20 = arith.addf %16, %19 : vector<16x1xf32>
    %21 = math.rsqrt %20 : vector<16x1xf32>
    %22 = vector.broadcast %21 : vector<16x1xf32> to vector<16x32xf32>
    %23 = arith.mulf %18, %22 : vector<16x32xf32>
    %24 = vector.broadcast %3 : vector<1x32xf32> to vector<16x32xf32>
    %25 = arith.mulf %23, %24 : vector<16x32xf32>
    %26 = vector.broadcast %5 : vector<1x32xf32> to vector<16x32xf32>
    %27 = arith.addf %25, %26 : vector<16x32xf32>
    %28 = arith.truncf %27 : vector<16x32xf32> to vector<16x32xbf16>
    %c0_9 = arith.constant 0 : index
    %c0_10 = arith.constant 0 : index
    %29 = vector.load %arg6[%c0_9, %c0_10] : memref<16x32xbf16, #tpu.memory_space<vmem>>, vector<16x32xbf16>
    tpu.vector_store %arg6[%c0_9, %c0_10], %28 {strides = array<i32>} : memref<16x32xbf16, #tpu.memory_space<vmem>>, vector<16x32xbf16>,
    %30 = arith.truncf %27 : vector<16x32xf32> to vector<16x32xbf16>
    %c0_11 = arith.constant 0 : index
    %c0_12 = arith.constant 0 : index
    %31 = vector.load %arg5[%c0_11, %c0_12] : memref<32x64xbf16, #tpu.memory_space<vmem>>, vector<32x64xbf16>
    %cst_13 = arith.constant dense<0.000000e+00> : vector<16x64xf32>
    %32 = tpu.matmul %30, %31, %cst_13 {dimension_numbers = #tpu.dot_dimension_numbers<[1], [0], [0], [1], [0, 0, 1, 1], [], []>} : vector<16x32xbf16>, vector<32x64xbf16>, vector<16x64xf32> -> vector<16x64xf32>
    %33 = arith.truncf %32 : vector<16x64xf32> to vector<16x64xbf16>
    %c0_14 = arith.constant 0 : index
    %c0_15 = arith.constant 0 : index
    %34 = vector.load %arg7[%c0_14, %c0_15] : memref<16x64xbf16, #tpu.memory_space<vmem>>, vector<16x64xbf16>
    tpu.vector_store %arg7[%c0_14, %c0_15], %33 {strides = array<i32>} : memref<16x64xbf16, #tpu.memory_space<vmem>>, vector<16x64xbf16>,
    return
  }
  func.func @transform_0(%arg0: i32, %arg1: i32) -> (i32, i32) {
    %c0_i32 = arith.constant 0 : i32
    %c0_i32_0 = arith.constant 0 : i32
    return %arg0, %c0_i32 : i32, i32
  }
  func.func @transform_1(%arg0: i32, %arg1: i32) -> (i32, i32) {
    %c0_i32 = arith.constant 0 : i32
    %c0_i32_0 = arith.constant 0 : i32
    %c0_i32_1 = arith.constant 0 : i32
    return %c0_i32, %c0_i32_0 : i32, i32
  }
  func.func @transform_2(%arg0: i32, %arg1: i32) -> (i32, i32) {
    %c0_i32 = arith.constant 0 : i32
    %c0_i32_0 = arith.constant 0 : i32
    %c0_i32_1 = arith.constant 0 : i32
    return %c0_i32, %c0_i32_0 : i32, i32
  }
  func.func @transform_3(%arg0: i32, %arg1: i32) -> (i32, i32) {
    %c0_i32 = arith.constant 0 : i32
    %c0_i32_0 = arith.constant 0 : i32
    return %c0_i32, %arg1 : i32, i32
  }
  func.func @transform_4(%arg0: i32, %arg1: i32) -> (i32, i32) {
    %c0_i32 = arith.constant 0 : i32
    %c0_i32_0 = arith.constant 0 : i32
    return %arg0, %c0_i32 : i32, i32
  }
  func.func @transform_5(%arg0: i32, %arg1: i32) -> (i32, i32) {
    %c0_i32 = arith.constant 0 : i32
    return %arg0, %arg1 : i32, i32
  }
}

module attributes {stable_mosaic.version = 11 : i64} {
  func.func @matmul_bias_kernel(%arg0: i32, %arg1: i32, %arg2: i32, %arg3: memref<2x32xbf16, #tpu.memory_space<vmem>>, %arg4: memref<32x128xbf16, #tpu.memory_space<vmem>>, %arg5: memref<1x128xbf16, #tpu.memory_space<vmem>>, %arg6: memref<2x128xbf16, #tpu.memory_space<vmem>>, %arg7: memref<2x128xf32, #tpu.memory_space<vmem>>) attributes {dimension_semantics = [#tpu.dimension_semantics<parallel>, #tpu.dimension_semantics<parallel>, #tpu.dimension_semantics<arbitrary>], iteration_bounds = array<i64: 1, 1, 1>, scalar_prefetch = 0 : i64, scratch_operands = 1 : i64, tpu.core_type = #tpu.core_type<tc>, window_params = [{transform_indices = @transform_0, window_bounds = array<i64: 2, 32>}, {transform_indices = @transform_1, window_bounds = array<i64: 32, 128>}, {transform_indices = @transform_2, window_bounds = array<i64: 1, 128>}, {transform_indices = @transform_3, window_bounds = array<i64: 2, 128>}]} {
    %c0_i32 = arith.constant 0 : i32
    %0 = arith.cmpi eq, %arg2, %c0_i32 : i32
    %1 = arith.extui %0 : i1 to i32
    %c0_i32_0 = arith.constant 0 : i32
    %2 = arith.cmpi ne, %1, %c0_i32_0 : i32
    scf.if %2 {
      %cst_10 = arith.constant 0.000000e+00 : f32
      %12 = vector.broadcast %cst_10 : f32 to vector<2x128xf32>
      %c0_11 = arith.constant 0 : index
      %c0_12 = arith.constant 0 : index
      %13 = vector.load %arg7[%c0_11, %c0_12] : memref<2x128xf32, #tpu.memory_space<vmem>>, vector<2x128xf32>
      tpu.vector_store %arg7[%c0_11, %c0_12], %12 {strides = array<i32>} : memref<2x128xf32, #tpu.memory_space<vmem>>, vector<2x128xf32>,
    } else {
    }
    %c0 = arith.constant 0 : index
    %c0_1 = arith.constant 0 : index
    %3 = vector.load %arg7[%c0, %c0_1] : memref<2x128xf32, #tpu.memory_space<vmem>>, vector<2x128xf32>
    %c0_2 = arith.constant 0 : index
    %c0_3 = arith.constant 0 : index
    %4 = vector.load %arg3[%c0_2, %c0_3] : memref<2x32xbf16, #tpu.memory_space<vmem>>, vector<2x32xbf16>
    %c0_4 = arith.constant 0 : index
    %c0_5 = arith.constant 0 : index
    %5 = vector.load %arg4[%c0_4, %c0_5] : memref<32x128xbf16, #tpu.memory_space<vmem>>, vector<32x128xbf16>
    %cst = arith.constant dense<0.000000e+00> : vector<2x128xf32>
    %6 = tpu.matmul %4, %5, %cst {dimension_numbers = #tpu.dot_dimension_numbers<[1], [0], [0], [1], [0, 0, 1, 1], [], []>} : vector<2x32xbf16>, vector<32x128xbf16>, vector<2x128xf32> -> vector<2x128xf32>
    %7 = arith.addf %3, %6 : vector<2x128xf32>
    %c0_6 = arith.constant 0 : index
    %c0_7 = arith.constant 0 : index
    %8 = vector.load %arg7[%c0_6, %c0_7] : memref<2x128xf32, #tpu.memory_space<vmem>>, vector<2x128xf32>
    tpu.vector_store %arg7[%c0_6, %c0_7], %7 {strides = array<i32>} : memref<2x128xf32, #tpu.memory_space<vmem>>, vector<2x128xf32>,
    %c0_i32_8 = arith.constant 0 : i32
    %9 = arith.cmpi eq, %arg2, %c0_i32_8 : i32
    %10 = arith.extui %9 : i1 to i32
    %c0_i32_9 = arith.constant 0 : i32
    %11 = arith.cmpi ne, %10, %c0_i32_9 : i32
    scf.if %11 {
      %c0_10 = arith.constant 0 : index
      %c0_11 = arith.constant 0 : index
      %12 = vector.load %arg7[%c0_10, %c0_11] : memref<2x128xf32, #tpu.memory_space<vmem>>, vector<2x128xf32>
      %c0_12 = arith.constant 0 : index
      %c0_13 = arith.constant 0 : index
      %13 = vector.load %arg5[%c0_12, %c0_13] : memref<1x128xbf16, #tpu.memory_space<vmem>>, vector<1x128xbf16>
      %14 = arith.extf %13 : vector<1x128xbf16> to vector<1x128xf32>
      %15 = vector.broadcast %14 : vector<1x128xf32> to vector<2x128xf32>
      %16 = arith.addf %12, %15 : vector<2x128xf32>
      %17 = arith.truncf %16 : vector<2x128xf32> to vector<2x128xbf16>
      %c0_14 = arith.constant 0 : index
      %c0_15 = arith.constant 0 : index
      %18 = vector.load %arg6[%c0_14, %c0_15] : memref<2x128xbf16, #tpu.memory_space<vmem>>, vector<2x128xbf16>
      tpu.vector_store %arg6[%c0_14, %c0_15], %17 {strides = array<i32>} : memref<2x128xbf16, #tpu.memory_space<vmem>>, vector<2x128xbf16>,
    } else {
    }
    return
  }
  func.func @transform_0(%arg0: i32, %arg1: i32, %arg2: i32) -> (i32, i32) {
    %c0_i32 = arith.constant 0 : i32
    return %arg0, %arg2 : i32, i32
  }
  func.func @transform_1(%arg0: i32, %arg1: i32, %arg2: i32) -> (i32, i32) {
    %c0_i32 = arith.constant 0 : i32
    return %arg2, %arg1 : i32, i32
  }
  func.func @transform_2(%arg0: i32, %arg1: i32, %arg2: i32) -> (i32, i32) {
    %c0_i32 = arith.constant 0 : i32
    %c0_i32_0 = arith.constant 0 : i32
    return %c0_i32, %arg1 : i32, i32
  }
  func.func @transform_3(%arg0: i32, %arg1: i32, %arg2: i32) -> (i32, i32) {
    %c0_i32 = arith.constant 0 : i32
    return %arg0, %arg1 : i32, i32
  }
}

module attributes {stable_mosaic.version = 11 : i64} {
  func.func @xent_kernel(%arg0: i32, %arg1: memref<8x3xbf16, #tpu.memory_space<vmem>>, %arg2: memref<8x1xi32, #tpu.memory_space<vmem>>, %arg3: memref<1x1xf32, #tpu.memory_space<vmem>>, %arg4: memref<1x1xf32, #tpu.memory_space<vmem>>, %arg5: memref<1x1xf32, #tpu.memory_space<vmem>>, %arg6: memref<1x1xf32, #tpu.memory_space<vmem>>) attributes {dimension_semantics = [#tpu.dimension_semantics<arbitrary>], iteration_bounds = array<i64: 1>, scalar_prefetch = 0 : i64, scratch_operands = 2 : i64, tpu.core_type = #tpu.core_type<tc>, window_params = [{transform_indices = @transform_0, window_bounds = array<i64: 8, 3>}, {transform_indices = @transform_1, window_bounds = array<i64: 8, 1>}, {pipeline_mode = #tpu.pipeline_mode<synchronous>, transform_indices = @transform_2, window_bounds = array<i64: 1, 1>}, {pipeline_mode = #tpu.pipeline_mode<synchronous>, transform_indices = @transform_3, window_bounds = array<i64: 1, 1>}]} {
    %c0_i32 = arith.constant 0 : i32
    %0 = arith.cmpi eq, %arg0, %c0_i32 : i32
    %1 = arith.extui %0 : i1 to i32
    %c0_i32_0 = arith.constant 0 : i32
    %2 = arith.cmpi ne, %1, %c0_i32_0 : i32
    scf.if %2 {
      %cst_18 = arith.constant 0.000000e+00 : f32
      %48 = vector.broadcast %cst_18 : f32 to vector<1x1xf32>
      %c0_19 = arith.constant 0 : index
      %c0_20 = arith.constant 0 : index
      %49 = vector.load %arg5[%c0_19, %c0_20] : memref<1x1xf32, #tpu.memory_space<vmem>>, vector<1x1xf32>
      tpu.vector_store %arg5[%c0_19, %c0_20], %48 {strides = array<i32>} : memref<1x1xf32, #tpu.memory_space<vmem>>, vector<1x1xf32>,
      %cst_21 = arith.constant 0.000000e+00 : f32
      %50 = vector.broadcast %cst_21 : f32 to vector<1x1xf32>
      %c0_22 = arith.constant 0 : index
      %c0_23 = arith.constant 0 : index
      %51 = vector.load %arg6[%c0_22, %c0_23] : memref<1x1xf32, #tpu.memory_space<vmem>>, vector<1x1xf32>
      tpu.vector_store %arg6[%c0_22, %c0_23], %50 {strides = array<i32>} : memref<1x1xf32, #tpu.memory_space<vmem>>, vector<1x1xf32>,
    } else {
    }
    %c0 = arith.constant 0 : index
    %c0_1 = arith.constant 0 : index
    %3 = vector.load %arg1[%c0, %c0_1] : memref<8x3xbf16, #tpu.memory_space<vmem>>, vector<8x3xbf16>
    %4 = arith.extf %3 : vector<8x3xbf16> to vector<8x3xf32>
    %c0_2 = arith.constant 0 : index
    %c0_3 = arith.constant 0 : index
    %5 = vector.load %arg2[%c0_2, %c0_3] : memref<8x1xi32, #tpu.memory_space<vmem>>, vector<8x1xi32>
    %cst = arith.constant dense<0xFF800000> : vector<8xf32>
    %6 = vector.multi_reduction <maximumf>, %4, %cst [1] : vector<8x3xf32> to vector<8xf32>
    %7 = vector.shape_cast %6 : vector<8xf32> to vector<8x1xf32>
    %8 = vector.broadcast %7 : vector<8x1xf32> to vector<8x3xf32>
    %9 = arith.subf %4, %8 : vector<8x3xf32>
    %10 = math.exp %9 : vector<8x3xf32>
    %cst_4 = arith.constant dense<0.000000e+00> : vector<8xf32>
    %11 = vector.multi_reduction <add>, %10, %cst_4 [1] : vector<8x3xf32> to vector<8xf32>
    %12 = vector.shape_cast %11 : vector<8xf32> to vector<8x1xf32>
    %13 = math.log %12 : vector<8x1xf32>
    %14 = arith.addf %13, %7 : vector<8x1xf32>
    %15 = tpu.iota {dimensions = array<i32: 1>} : vector<8x3xi32>
    %16 = vector.broadcast %5 : vector<8x1xi32> to vector<8x3xi32>
    %17 = arith.cmpi eq, %15, %16 : vector<8x3xi32>
    %18 = arith.extui %17 : vector<8x3xi1> to vector<8x3xi32>
    %19 = arith.sitofp %18 : vector<8x3xi32> to vector<8x3xf32>
    %20 = arith.mulf %19, %4 : vector<8x3xf32>
    %cst_5 = arith.constant dense<0.000000e+00> : vector<8xf32>
    %21 = vector.multi_reduction <add>, %20, %cst_5 [1] : vector<8x3xf32> to vector<8xf32>
    %22 = vector.shape_cast %21 : vector<8xf32> to vector<8x1xf32>
    %c-100_i32 = arith.constant -100 : i32
    %23 = vector.broadcast %c-100_i32 : i32 to vector<8x1xi32>
    %24 = arith.cmpi ne, %5, %23 : vector<8x1xi32>
    %25 = arith.extui %24 : vector<8x1xi1> to vector<8x1xi32>
    %26 = arith.sitofp %25 : vector<8x1xi32> to vector<8x1xf32>
    %c0_6 = arith.constant 0 : index
    %c0_7 = arith.constant 0 : index
    %27 = vector.load %arg5[%c0_6, %c0_7] : memref<1x1xf32, #tpu.memory_space<vmem>>, vector<1x1xf32>
    %28 = arith.subf %14, %22 : vector<8x1xf32>
    %29 = arith.mulf %28, %26 : vector<8x1xf32>
    %30 = vector.shape_cast %29 : vector<8x1xf32> to vector<1x8x1xf32>
    %cst_8 = arith.constant dense<0.000000e+00> : vector<1xf32>
    %31 = vector.multi_reduction <add>, %30, %cst_8 [1, 2] : vector<1x8x1xf32> to vector<1xf32>
    %32 = vector.shape_cast %31 : vector<1xf32> to vector<1x1x1xf32>
    %33 = vector.extract %32[0, 0, 0] : f32 from vector<1x1x1xf32>
    %34 = vector.broadcast %33 : f32 to vector<1x1xf32>
    %35 = arith.addf %27, %34 : vector<1x1xf32>
    %c0_9 = arith.constant 0 : index
    %c0_10 = arith.constant 0 : index
    %36 = vector.load %arg5[%c0_9, %c0_10] : memref<1x1xf32, #tpu.memory_space<vmem>>, vector<1x1xf32>
    tpu.vector_store %arg5[%c0_9, %c0_10], %35 {strides = array<i32>} : memref<1x1xf32, #tpu.memory_space<vmem>>, vector<1x1xf32>,
    %c0_11 = arith.constant 0 : index
    %c0_12 = arith.constant 0 : index
    %37 = vector.load %arg6[%c0_11, %c0_12] : memref<1x1xf32, #tpu.memory_space<vmem>>, vector<1x1xf32>
    %38 = vector.shape_cast %26 : vector<8x1xf32> to vector<1x8x1xf32>
    %cst_13 = arith.constant dense<0.000000e+00> : vector<1xf32>
    %39 = vector.multi_reduction <add>, %38, %cst_13 [1, 2] : vector<1x8x1xf32> to vector<1xf32>
    %40 = vector.shape_cast %39 : vector<1xf32> to vector<1x1x1xf32>
    %41 = vector.extract %40[0, 0, 0] : f32 from vector<1x1x1xf32>
    %42 = vector.broadcast %41 : f32 to vector<1x1xf32>
    %43 = arith.addf %37, %42 : vector<1x1xf32>
    %c0_14 = arith.constant 0 : index
    %c0_15 = arith.constant 0 : index
    %44 = vector.load %arg6[%c0_14, %c0_15] : memref<1x1xf32, #tpu.memory_space<vmem>>, vector<1x1xf32>
    tpu.vector_store %arg6[%c0_14, %c0_15], %43 {strides = array<i32>} : memref<1x1xf32, #tpu.memory_space<vmem>>, vector<1x1xf32>,
    %c0_i32_16 = arith.constant 0 : i32
    %45 = arith.cmpi eq, %arg0, %c0_i32_16 : i32
    %46 = arith.extui %45 : i1 to i32
    %c0_i32_17 = arith.constant 0 : i32
    %47 = arith.cmpi ne, %46, %c0_i32_17 : i32
    scf.if %47 {
      %c0_18 = arith.constant 0 : index
      %c0_19 = arith.constant 0 : index
      %48 = vector.load %arg5[%c0_18, %c0_19] : memref<1x1xf32, #tpu.memory_space<vmem>>, vector<1x1xf32>
      %c0_20 = arith.constant 0 : index
      %c0_21 = arith.constant 0 : index
      %49 = vector.load %arg3[%c0_20, %c0_21] : memref<1x1xf32, #tpu.memory_space<vmem>>, vector<1x1xf32>
      tpu.vector_store %arg3[%c0_20, %c0_21], %48 {strides = array<i32>} : memref<1x1xf32, #tpu.memory_space<vmem>>, vector<1x1xf32>,
      %c0_22 = arith.constant 0 : index
      %c0_23 = arith.constant 0 : index
      %50 = vector.load %arg6[%c0_22, %c0_23] : memref<1x1xf32, #tpu.memory_space<vmem>>, vector<1x1xf32>
      %c0_24 = arith.constant 0 : index
      %c0_25 = arith.constant 0 : index
      %51 = vector.load %arg4[%c0_24, %c0_25] : memref<1x1xf32, #tpu.memory_space<vmem>>, vector<1x1xf32>
      tpu.vector_store %arg4[%c0_24, %c0_25], %50 {strides = array<i32>} : memref<1x1xf32, #tpu.memory_space<vmem>>, vector<1x1xf32>,
    } else {
    }
    return
  }
  func.func @transform_0(%arg0: i32) -> (i32, i32) {
    %c0_i32 = arith.constant 0 : i32
    %c0_i32_0 = arith.constant 0 : i32
    return %arg0, %c0_i32 : i32, i32
  }
  func.func @transform_1(%arg0: i32) -> (i32, i32) {
    %c0_i32 = arith.constant 0 : i32
    %c0_i32_0 = arith.constant 0 : i32
    return %arg0, %c0_i32 : i32, i32
  }
  func.func @transform_2(%arg0: i32) -> (i32, i32) {
    %c0_i32 = arith.constant 0 : i32
    %c0_i32_0 = arith.constant 0 : i32
    %c0_i32_1 = arith.constant 0 : i32
    return %c0_i32, %c0_i32_0 : i32, i32
  }
  func.func @transform_3(%arg0: i32) -> (i32, i32) {
    %c0_i32 = arith.constant 0 : i32
    %c0_i32_0 = arith.constant 0 : i32
    %c0_i32_1 = arith.constant 0 : i32
    return %c0_i32, %c0_i32_0 : i32, i32
  }
}

module attributes {stable_mosaic.version = 11 : i64} {
  func.func @xent_kernel(%arg0: i32, %arg1: memref<16x64xbf16, #tpu.memory_space<vmem>>, %arg2: memref<16x1xi32, #tpu.memory_space<vmem>>, %arg3: memref<1x1xf32, #tpu.memory_space<vmem>>, %arg4: memref<1x1xf32, #tpu.memory_space<vmem>>, %arg5: memref<1x1xf32, #tpu.memory_space<vmem>>, %arg6: memref<1x1xf32, #tpu.memory_space<vmem>>) attributes {dimension_semantics = [#tpu.dimension_semantics<arbitrary>], iteration_bounds = array<i64: 1>, scalar_prefetch = 0 : i64, scratch_operands = 2 : i64, tpu.core_type = #tpu.core_type<tc>, window_params = [{transform_indices = @transform_0, window_bounds = array<i64: 16, 64>}, {transform_indices = @transform_1, window_bounds = array<i64: 16, 1>}, {pipeline_mode = #tpu.pipeline_mode<synchronous>, transform_indices = @transform_2, window_bounds = array<i64: 1, 1>}, {pipeline_mode = #tpu.pipeline_mode<synchronous>, transform_indices = @transform_3, window_bounds = array<i64: 1, 1>}]} {
    %c0_i32 = arith.constant 0 : i32
    %0 = arith.cmpi eq, %arg0, %c0_i32 : i32
    %1 = arith.extui %0 : i1 to i32
    %c0_i32_0 = arith.constant 0 : i32
    %2 = arith.cmpi ne, %1, %c0_i32_0 : i32
    scf.if %2 {
      %cst_18 = arith.constant 0.000000e+00 : f32
      %48 = vector.broadcast %cst_18 : f32 to vector<1x1xf32>
      %c0_19 = arith.constant 0 : index
      %c0_20 = arith.constant 0 : index
      %49 = vector.load %arg5[%c0_19, %c0_20] : memref<1x1xf32, #tpu.memory_space<vmem>>, vector<1x1xf32>
      tpu.vector_store %arg5[%c0_19, %c0_20], %48 {strides = array<i32>} : memref<1x1xf32, #tpu.memory_space<vmem>>, vector<1x1xf32>,
      %cst_21 = arith.constant 0.000000e+00 : f32
      %50 = vector.broadcast %cst_21 : f32 to vector<1x1xf32>
      %c0_22 = arith.constant 0 : index
      %c0_23 = arith.constant 0 : index
      %51 = vector.load %arg6[%c0_22, %c0_23] : memref<1x1xf32, #tpu.memory_space<vmem>>, vector<1x1xf32>
      tpu.vector_store %arg6[%c0_22, %c0_23], %50 {strides = array<i32>} : memref<1x1xf32, #tpu.memory_space<vmem>>, vector<1x1xf32>,
    } else {
    }
    %c0 = arith.constant 0 : index
    %c0_1 = arith.constant 0 : index
    %3 = vector.load %arg1[%c0, %c0_1] : memref<16x64xbf16, #tpu.memory_space<vmem>>, vector<16x64xbf16>
    %4 = arith.extf %3 : vector<16x64xbf16> to vector<16x64xf32>
    %c0_2 = arith.constant 0 : index
    %c0_3 = arith.constant 0 : index
    %5 = vector.load %arg2[%c0_2, %c0_3] : memref<16x1xi32, #tpu.memory_space<vmem>>, vector<16x1xi32>
    %cst = arith.constant dense<0xFF800000> : vector<16xf32>
    %6 = vector.multi_reduction <maximumf>, %4, %cst [1] : vector<16x64xf32> to vector<16xf32>
    %7 = vector.shape_cast %6 : vector<16xf32> to vector<16x1xf32>
    %8 = vector.broadcast %7 : vector<16x1xf32> to vector<16x64xf32>
    %9 = arith.subf %4, %8 : vector<16x64xf32>
    %10 = math.exp %9 : vector<16x64xf32>
    %cst_4 = arith.constant dense<0.000000e+00> : vector<16xf32>
    %11 = vector.multi_reduction <add>, %10, %cst_4 [1] : vector<16x64xf32> to vector<16xf32>
    %12 = vector.shape_cast %11 : vector<16xf32> to vector<16x1xf32>
    %13 = math.log %12 : vector<16x1xf32>
    %14 = arith.addf %13, %7 : vector<16x1xf32>
    %15 = tpu.iota {dimensions = array<i32: 1>} : vector<16x64xi32>
    %16 = vector.broadcast %5 : vector<16x1xi32> to vector<16x64xi32>
    %17 = arith.cmpi eq, %15, %16 : vector<16x64xi32>
    %18 = arith.extui %17 : vector<16x64xi1> to vector<16x64xi32>
    %19 = arith.sitofp %18 : vector<16x64xi32> to vector<16x64xf32>
    %20 = arith.mulf %19, %4 : vector<16x64xf32>
    %cst_5 = arith.constant dense<0.000000e+00> : vector<16xf32>
    %21 = vector.multi_reduction <add>, %20, %cst_5 [1] : vector<16x64xf32> to vector<16xf32>
    %22 = vector.shape_cast %21 : vector<16xf32> to vector<16x1xf32>
    %c-100_i32 = arith.constant -100 : i32
    %23 = vector.broadcast %c-100_i32 : i32 to vector<16x1xi32>
    %24 = arith.cmpi ne, %5, %23 : vector<16x1xi32>
    %25 = arith.extui %24 : vector<16x1xi1> to vector<16x1xi32>
    %26 = arith.sitofp %25 : vector<16x1xi32> to vector<16x1xf32>
    %c0_6 = arith.constant 0 : index
    %c0_7 = arith.constant 0 : index
    %27 = vector.load %arg5[%c0_6, %c0_7] : memref<1x1xf32, #tpu.memory_space<vmem>>, vector<1x1xf32>
    %28 = arith.subf %14, %22 : vector<16x1xf32>
    %29 = arith.mulf %28, %26 : vector<16x1xf32>
    %30 = vector.shape_cast %29 : vector<16x1xf32> to vector<1x16x1xf32>
    %cst_8 = arith.constant dense<0.000000e+00> : vector<1xf32>
    %31 = vector.multi_reduction <add>, %30, %cst_8 [1, 2] : vector<1x16x1xf32> to vector<1xf32>
    %32 = vector.shape_cast %31 : vector<1xf32> to vector<1x1x1xf32>
    %33 = vector.extract %32[0, 0, 0] : f32 from vector<1x1x1xf32>
    %34 = vector.broadcast %33 : f32 to vector<1x1xf32>
    %35 = arith.addf %27, %34 : vector<1x1xf32>
    %c0_9 = arith.constant 0 : index
    %c0_10 = arith.constant 0 : index
    %36 = vector.load %arg5[%c0_9, %c0_10] : memref<1x1xf32, #tpu.memory_space<vmem>>, vector<1x1xf32>
    tpu.vector_store %arg5[%c0_9, %c0_10], %35 {strides = array<i32>} : memref<1x1xf32, #tpu.memory_space<vmem>>, vector<1x1xf32>,
    %c0_11 = arith.constant 0 : index
    %c0_12 = arith.constant 0 : index
    %37 = vector.load %arg6[%c0_11, %c0_12] : memref<1x1xf32, #tpu.memory_space<vmem>>, vector<1x1xf32>
    %38 = vector.shape_cast %26 : vector<16x1xf32> to vector<1x16x1xf32>
    %cst_13 = arith.constant dense<0.000000e+00> : vector<1xf32>
    %39 = vector.multi_reduction <add>, %38, %cst_13 [1, 2] : vector<1x16x1xf32> to vector<1xf32>
    %40 = vector.shape_cast %39 : vector<1xf32> to vector<1x1x1xf32>
    %41 = vector.extract %40[0, 0, 0] : f32 from vector<1x1x1xf32>
    %42 = vector.broadcast %41 : f32 to vector<1x1xf32>
    %43 = arith.addf %37, %42 : vector<1x1xf32>
    %c0_14 = arith.constant 0 : index
    %c0_15 = arith.constant 0 : index
    %44 = vector.load %arg6[%c0_14, %c0_15] : memref<1x1xf32, #tpu.memory_space<vmem>>, vector<1x1xf32>
    tpu.vector_store %arg6[%c0_14, %c0_15], %43 {strides = array<i32>} : memref<1x1xf32, #tpu.memory_space<vmem>>, vector<1x1xf32>,
    %c0_i32_16 = arith.constant 0 : i32
    %45 = arith.cmpi eq, %arg0, %c0_i32_16 : i32
    %46 = arith.extui %45 : i1 to i32
    %c0_i32_17 = arith.constant 0 : i32
    %47 = arith.cmpi ne, %46, %c0_i32_17 : i32
    scf.if %47 {
      %c0_18 = arith.constant 0 : index
      %c0_19 = arith.constant 0 : index
      %48 = vector.load %arg5[%c0_18, %c0_19] : memref<1x1xf32, #tpu.memory_space<vmem>>, vector<1x1xf32>
      %c0_20 = arith.constant 0 : index
      %c0_21 = arith.constant 0 : index
      %49 = vector.load %arg3[%c0_20, %c0_21] : memref<1x1xf32, #tpu.memory_space<vmem>>, vector<1x1xf32>
      tpu.vector_store %arg3[%c0_20, %c0_21], %48 {strides = array<i32>} : memref<1x1xf32, #tpu.memory_space<vmem>>, vector<1x1xf32>,
      %c0_22 = arith.constant 0 : index
      %c0_23 = arith.constant 0 : index
      %50 = vector.load %arg6[%c0_22, %c0_23] : memref<1x1xf32, #tpu.memory_space<vmem>>, vector<1x1xf32>
      %c0_24 = arith.constant 0 : index
      %c0_25 = arith.constant 0 : index
      %51 = vector.load %arg4[%c0_24, %c0_25] : memref<1x1xf32, #tpu.memory_space<vmem>>, vector<1x1xf32>
      tpu.vector_store %arg4[%c0_24, %c0_25], %50 {strides = array<i32>} : memref<1x1xf32, #tpu.memory_space<vmem>>, vector<1x1xf32>,
    } else {
    }
    return
  }
  func.func @transform_0(%arg0: i32) -> (i32, i32) {
    %c0_i32 = arith.constant 0 : i32
    %c0_i32_0 = arith.constant 0 : i32
    return %arg0, %c0_i32 : i32, i32
  }
  func.func @transform_1(%arg0: i32) -> (i32, i32) {
    %c0_i32 = arith.constant 0 : i32
    %c0_i32_0 = arith.constant 0 : i32
    return %arg0, %c0_i32 : i32, i32
  }
  func.func @transform_2(%arg0: i32) -> (i32, i32) {
    %c0_i32 = arith.constant 0 : i32
    %c0_i32_0 = arith.constant 0 : i32
    %c0_i32_1 = arith.constant 0 : i32
    return %c0_i32, %c0_i32_0 : i32, i32
  }
  func.func @transform_3(%arg0: i32) -> (i32, i32) {
    %c0_i32 = arith.constant 0 : i32
    %c0_i32_0 = arith.constant 0 : i32
    %c0_i32_1 = arith.constant 0 : i32
    return %c0_i32, %c0_i32_0 : i32, i32
  }
}

</mosaic_0001>

<bundles_post_ra>
// kernel: run.14
= control target key start
LH: loop header
LB: loop body
LE: loop exit
PB: predicated region body
PF: predicated region fallthrough
CT: control target
= control target key end

     0   :  { %vm22_vm0 = vcmask 261120   ;;  %v161_v0 = vmov 0.0   ;;  %vm162_vm1 = vmmov 0   ;;  %v106_v4 = vlaneseq  ;;  %s214_s1 = inlined_call_operand.vmem [shape: bf16[32,32], index: 1, kind: input, shape index: {}]   ;;  %s215_s0 = inlined_call_operand.vmem [shape: bf16[16,32], index: 0, kind: input, shape index: {}]   ;;  %s216_s2 = inlined_call_operand.vmem [shape: bf16[1,32], index: 2, kind: input, shape index: {}]   ;;  %s217_s3 = inlined_call_operand.vmem [shape: bf16[16,32], index: 3, kind: input, shape index: {}]   ;;  %s218_s4 = inlined_call_operand.vmem [shape: bf16[16,32], index: 4, kind: output, shape index: {}]  }
   0x1   :  { %148 = vmatprep.subr.bf16.mxu0 %v161_v0  ;;  %v158_v1 = vld [vmem:[%s214_s1] sm:$0xff]   ;;  %152 = vmatprep.mubr.msk.bf16.mxu0 %vm162_vm1, %v161_v0  ;;  %23 = vst.msk [vmem:[#allocation2] sm:$0xff] %vm22_vm0, %v161_v0  ;;  %24 = vst.msk [vmem:[#allocation2 + $0x8] sm:$0xff] %vm22_vm0, %v161_v0  ;;  %v159_v2 = vld [vmem:[%s214_s1 + $0x8] sm:$0xff]   ;;  %vm126_vm2 = vcmask 257024  }
   0x2   :  { %149 = vmatpush3.bf16.msra.mxu0 %v158_v1  ;;  %v160_v3 = vld [vmem:[%s215_s0] sm:$0xff]   ;;  %v107_v6 = vshrl.u32 %v106_v4, 7 }
   0x3   :  { %150 = vmatprep.subr.bf16.mxu0 %v161_v0  ;;  %v104_v8 = vld [vmem:[%s216_s2] sm:$0x1] }
   0x4   :  { %v105_v13 = vunpack.c.l.bf16 %v104_v8  ;;  %v108_v14 = vsub.s32 0, %v107_v6  ;;  %v142_v17 = vld [vmem:[%s217_s3] sm:$0xff]  }
   0x5   :  { %v143_v19 = vunpack.c.l.bf16 %v142_v17  ;;  %v144_v22 = vunpack.c.h.bf16 %v142_v17 }
   0x6   :  { %151 = vmatpush3.bf16.msra.mxu0 %v159_v2  ;;  %v109_v18 = vrot.slane %v105_v13, %v108_v14 }
   0x8   :  { %v25_v5 = vld [vmem:[#allocation2] sm:$0xff]  ;;  %v26_v9 = vld [vmem:[#allocation2 + $0x8] sm:$0xff] }
   0x9   :  { %153 = vmatmul.mubr.msk.bf16.vlgmr.msra.gmra.mrb[0].mxu0 %vm22_vm0, %v160_v3 }
  0xdc   :  { %v88_v7 = vpop.f32.mrb[0].mxu0 }
  0xdd   :  { %v95_v10 = vadd.f32 %v88_v7, %v25_v5  ;;  %v154_v11 = vpop.f32.mrb[1].mxu0 }
  0xde   :  { %v91_v12 = vpop.f32.mrb[2].mxu0 }
  0xdf   :  { %97 = vst.msk [vmem:[#allocation2] sm:$0xff] %vm22_vm0, %v95_v10  ;;  %v96_v15 = vadd.f32 %v91_v12, %v26_v9  ;;  %v155_v16 = vpop.f32.mrb[3].mxu0 }
  0xe1   :  { %98 = vst.msk [vmem:[#allocation2 + $0x8] sm:$0xff] %vm22_vm0, %v96_v15 }
  0xe6   :  { %v102_v20 = vld [vmem:[#allocation2] sm:$0xff] }
  0xe7   :  { %v110_v21 = vadd.f32 %v109_v18, %v102_v20 }
  0xe8   :  { %v103_v23 = vld [vmem:[#allocation2 + $0x8] sm:$0xff] }
  0xe9   :  { %v116_v24 = vadd.f32 %v143_v19, %v110_v21  ;;  %v111_v25 = vadd.f32 %v109_v18, %v103_v23 }
  0xeb   :  { %v139_v26 = vpack.c.bf16 %v116_v24, %v116_v24  ;;  %v117_v27 = vadd.f32 %v144_v22, %v111_v25 }
  0xed   :  { %127 = vst.msk [vmem:[%s218_s4] sm:$0xf] %vm126_vm2, %v139_v26  ;;  %v140_v28 = vpack.c.bf16 %v117_v27, %v117_v27 }
  0xef   :  { %128 = vst.msk [vmem:[%s218_s4 + $0x4] sm:$0xf] %vm126_vm2, %v140_v28 }

// kernel: run.12
= control target key start
LH: loop header
LB: loop body
LE: loop exit
PB: predicated region body
PF: predicated region fallthrough
CT: control target
= control target key end

     0   :  { %vm29_vm0 = vcmask 261120   ;;  %v181_v16 = vmov 0.0   ;;  %vm182_vm1 = vmmov 0   ;;  %v57_v22 = vlaneseq  ;;  %s242_s0 = inlined_call_operand.vmem [shape: bf16[16,32], index: 0, kind: input, shape index: {}]   ;;  %s243_s3 = inlined_call_operand.vmem [shape: bf16[32,96], index: 3, kind: input, shape index: {}]   ;;  %s244_s1 = inlined_call_operand.vmem [shape: bf16[1,32], index: 1, kind: input, shape index: {}]   ;;  %s245_s2 = inlined_call_operand.vmem [shape: bf16[1,32], index: 2, kind: input, shape index: {}]   ;;  %s246_s4 = inlined_call_operand.vmem [shape: bf16[1,96], index: 4, kind: input, shape index: {}]   ;;  %s247_s5 = inlined_call_operand.vmem [shape: bf16[16,96], index: 5, kind: output, shape index: {}]  }
   0x1   :  { %v159_v0 = vld [vmem:[%s242_s0] sm:$0xff]   ;;  %165 = vmatprep.subr.bf16.mxu0 %v181_v16  ;;  %v176_v17 = vld [vmem:[%s243_s3 + $0x8] sm:$0xff]   ;;  %169 = vmatprep.mubr.msk.bf16.mxu0 %vm182_vm1, %v181_v16  ;;  %vm144_vm2 = vcmask 781312  }
   0x2   :  { %v160_v1 = vunpack.c.l.bf16 %v159_v0  ;;  %v161_v2 = vunpack.c.h.bf16 %v159_v0  ;;  %v175_v15 = vld [vmem:[%s243_s3] sm:$0xff]   ;;  %v58_v25 = vshrl.u32 %v57_v22, 7 }
   0x3   :  { %166 = vmatpush3.bf16.msra.mxu0 %v175_v15  ;;  %v25_v26 = vld [vmem:[%s244_s1] sm:$0x1] }
   0x4   :  { %v30_v3 = vsel %vm29_vm0, %v160_v1, 0.0  ;;  %v33_v4 = vsel %vm29_vm0, %v161_v2, 0.0  ;;  %167 = vmatprep.subr.bf16.mxu0 %v181_v16  ;;  %v26_v27 = vunpack.c.l.bf16 %v25_v26  ;;  %v59_v28 = vsub.s32 0, %v58_v25  ;;  %v27_v29 = vld [vmem:[%s245_s2] sm:$0x1] }
   0x5   :  { %31 = vadd.xlane.f32.xlu0 %v30_v3  ;;  %v28_v32 = vunpack.c.l.bf16 %v27_v29  ;;  %v74_v42 = vld [vmem:[%s246_s4] sm:$0x1] }
   0x6   :  { %v60_v33 = vrot.slane %v26_v27, %v59_v28  ;;  %v75_v43 = vunpack.c.l.bf16 %v74_v42 }
   0x7   :  { %168 = vmatpush3.bf16.msra.mxu0 %v176_v17  ;;  %v66_v37 = vrot.slane %v28_v32, %v59_v28 }
   0x8   :  { %v79_v44 = vrot.slane %v75_v43, %v59_v28 }
   0x9   :  { %34 = vadd.xlane.f32.xlu0 %v33_v4 }
  0x92   :  { %v32_v5 = vpop.xlane.xlu0 %31 }
  0x93   :  { %v37_v6 = vmul.f32 0.03125, %v32_v5 }
  0x95   :  { %v39_v7 = vsub.f32 %v160_v1, %v37_v6 }
  0x96   :  { %v35_v8 = vpop.xlane.xlu0 %34 }
  0x97   :  { %v38_v9 = vmul.f32 0.03125, %v35_v8  ;;  %v41_v10 = vmul.f32 %v39_v7, %v39_v7 }
  0x99   :  { %v40_v11 = vsub.f32 %v161_v2, %v38_v9  ;;  %v43_v12 = vsel %vm29_vm0, %v41_v10, 0.0 }
  0x9a   :  { %44 = vadd.xlane.f32.xlu1 %v43_v12 }
  0x9b   :  { %v42_v13 = vmul.f32 %v40_v11, %v40_v11 }
  0x9d   :  { %v46_v14 = vsel %vm29_vm0, %v42_v13, 0.0 }
  0x9e   :  { %47 = vadd.xlane.f32.xlu1 %v46_v14 }
 0x127   :  { %v45_v18 = vpop.xlane.xlu1 %44 }
 0x128   :  { %v49_v19 = vmul.f32 0.03125, %v45_v18 }
 0x12a   :  { %v51_v20 = vadd.f32 1e-05, %v49_v19 }
 0x12b   :  { %v48_v21 = vpop.xlane.xlu1 %47 }
 0x12c   :  { %177 = vrsqrt.f32 %v51_v20  ;;  %v50_v23 = vmul.f32 0.03125, %v48_v21 }
 0x12e   :  { %v52_v24 = vadd.f32 1e-05, %v50_v23 }
 0x130   :  { %179 = vrsqrt.f32 %v52_v24 }
 0x136   :  { %v178_v30 = vpop.eup %177 }
 0x137   :  { %v55_v31 = vmul.f32 %v178_v30, %v39_v7 }
 0x139   :  { %v61_v36 = vmul.f32 %v60_v33, %v55_v31 }
 0x13a   :  { %v180_v34 = vpop.eup %179 }
 0x13b   :  { %v56_v35 = vmul.f32 %v180_v34, %v40_v11  ;;  %v67_v39 = vadd.f32 %v66_v37, %v61_v36 }
 0x13d   :  { %v62_v38 = vmul.f32 %v60_v33, %v56_v35 }
 0x13f   :  { %v68_v40 = vadd.f32 %v66_v37, %v62_v38 }
 0x141   :  { %v69_v41 = vpack.c.bf16 %v68_v40, %v67_v39 }
 0x143   :  { %170 = vmatmul.mubr.msk.bf16.vlgmr.msra.gmra.mrb[0].mxu0 %vm29_vm0, %v69_v41 }
 0x216   :  { %v129_v45 = vpop.f32.mrb[0].mxu0 }
 0x217   :  { %v130_v46 = vadd.f32 %v129_v45, %v79_v44  ;;  %v171_v47 = vpop.f32.mrb[1].mxu0 }
 0x218   :  { %v132_v48 = vpop.f32.mrb[2].mxu0 }
 0x219   :  { %v156_v49 = vpack.c.bf16 %v130_v46, %v130_v46  ;;  %v133_v50 = vadd.f32 %v132_v48, %v79_v44  ;;  %v172_v51 = vpop.f32.mrb[3].mxu0 }
 0x21b   :  { %145 = vst.msk [vmem:[%s247_s5] sm:$0xf] %vm144_vm2, %v156_v49  ;;  %v157_v52 = vpack.c.bf16 %v133_v50, %v133_v50 }
 0x21d   :  { %146 = vst.msk [vmem:[%s247_s5 + $0x4] sm:$0xf] %vm144_vm2, %v157_v52 }

// kernel: run.13
= control target key start
LH: loop header
LB: loop body
LE: loop exit
PB: predicated region body
PF: predicated region fallthrough
CT: control target
= control target key end

     0   :  { %s800_s6 = smov 0   ;;  %s907_s0 = inlined_call_operand.vmem [shape: bf16[2,8,96], index: 0, kind: input, shape index: {}]   ;;  %s908_s1 = inlined_call_operand.vmem [shape: bf16[2,8,32], index: 1, kind: output, shape index: {}]  }
   0x1 LB: > { %s643_s7 = sadd.s32 4294967295, %s772_s6   ;;  %p647_p0 = scmp.ge.s32.totalorder %s772_s6, 1  ;;  %s772_s6 = sphi %s800_s6, %s11_s6  }
   0x2   : > { %p86_p1 = scmp.lt.s32.totalorder %s772_s6, 3 }
   0x4   : > { %p87_p2 = pnand %p647_p0, %p86_p1 }
   0x5   : > { %p104_p3 = scmp.lt.s32.totalorder (!%p87_p2), %s643_s7, 1  ;;  %v774_v0 = vmov (!%p87_p2), 0.0   ;;  %vm775_vm0 = vmmov (!%p87_p2), 0   ;;  %s776_s12 = smov (!%p87_p2), 96   ;;  %vm124_vm1 = vcmask (!%p87_p2), 64512   ;;  %v114_v5 = vlaneseq (!%p87_p2) }
   0x6   : > { %90 = sbr.rel (%p87_p2) target bundleno = 1604 (0x644), region = 24  ;;  %677 = vmatprep.subr.bf16.mxu0 (!%p87_p2), %v774_v0  ;;  %679 = vmatprep.mubr.msk.bf16.mxu0 (!%p87_p2), %vm775_vm0, %v774_v0  ;;  %s777_s13 = smov (!%p87_p2), 64   ;;  %vm190_vm3 = vcmask (!%p87_p2), 1043456   ;;  %vm583_vm4 = vcmask (!%p87_p2), 130048   ;;  %vm585_vm5 = vcmask (!%p87_p2), 195584   ;;  %vm588_vm6 = vcmask (!%p87_p2), 257024  }
   0x7   : > { %683 = vmatprep.subr.bf16.mxu1 (!%p87_p2), %v774_v0  ;;  %685 = vmatprep.mubr.msk.bf16.mxu1 (!%p87_p2), %vm775_vm0, %v774_v0  ;;  %s778_s14 = smov (!%p87_p2), 88   ;;  %v832_v6 = vshrl.u32 (!%p87_p2), %v114_v5, 7  ;;  %v834_v7 = vand.u32 (!%p87_p2), 127, %v114_v5  ;;  %s779_s15 = smov (!%p87_p2), 72  }
   0x8   : > { %s780_s16 = smov (!%p87_p2), 120   ;;  %s781_s17 = smov (!%p87_p2), 80  }
   0x9   : > { %vm118_vm2 = vcmp.le.s32.totalorder (!%p87_p2), %v834_v7, %v832_v6  ;;  %s782_s18 = smov (!%p87_p2), 112   ;;  %s783_s19 = smov (!%p87_p2), 104  }
   0xa   : > { %s784_s20 = smov (!%p87_p2), 56   ;;  %s785_s21 = smov (!%p87_p2), 48  }
   0xb   : > { %s786_s22 = smov (!%p87_p2), 40   ;;  %s787_s23 = smov (!%p87_p2), 8  }
   0xc   : > { %s788_s24 = smov (!%p87_p2), 16   ;;  %s789_s25 = smov (!%p87_p2), 24  }
   0xd   : > { %s910_s7 = smov (!%p104_p3, %s643_s7), 1 }
   0xe   : > { %s648_s8 = sshll.u32 %s910_s7, 2 }
   0xf   : > { %s107_s11 = scalar_lea.vmem %s907_s0, %s648_s8  ;;  %s111_s28 = scalar_lea.vmem %s908_s1, %s648_s8 }
  0x10   : > { %v113_v1 = vld [vmem:[%s107_s11] sm:$0xf] }
  0x11   : > { %v822_v2 = vcombine.low %v113_v1, %v113_v1 }
  0x13   : > { %122 = vrot.lane.b32.xlu0 %v822_v2, %s776_s12  ;;  %185 = vrot.lane.b32.xlu1 %v822_v2, %s777_s13 }
  0x17   : > { %236 = vrot.lane.b32.xlu1 %v822_v2, %s778_s14 }
  0x85   : > { %v123_v3 = vpop.permute.xlu0 %122  ;;  %v186_v15 = vpop.permute.xlu1 %185 }
  0x86   : > { %v129_v4 = vsel %vm124_vm1, %v123_v3, 0  ;;  %v192_v16 = vsel %vm190_vm3, %v186_v15, 0 }
  0x87   : > { %678 = vmatpush3.bf16.xpose.msra.mxu0 %v129_v4  ;;  %684 = vmatpush3.bf16.msra.mxu1 %v192_v16 }
  0x88   : > { %695 = vmatprep.subr.bf16.mxu0 %v774_v0  ;;  %689 = vmatprep.subr.bf16.mxu1 %v774_v0 }
  0x89   : > { %v237_v22 = vpop.permute.xlu1 %236 }
  0x8a   : > { %v242_v28 = vsel %vm124_vm1, %v237_v22, 0 }
  0x8e   : > { %680 = vmatmul.mubr.msk.bf16.vlgmr.msra.gmra.mrb[0].mxu0 %vm124_vm1, %v113_v1 }
  0x8f   : > { %697 = vmatprep.mubr.msk.bf16.mxu0 %vm775_vm0, %v774_v0 }
 0x161   : > { %v165_v8 = vpop.f32.mrb[0].mxu0 }
 0x162   : > { %v171_v9 = vmul.f32 0.35355338, %v165_v8  ;;  %v681_v10 = vpop.f32.mrb[1].mxu0 }
 0x163   : > { %v168_v11 = vpop.f32.mrb[2].mxu0 }
 0x164   : > { %v682_v12 = vpop.f32.mrb[3].mxu0  ;;  %v172_v13 = vsel %vm118_vm2, %v171_v9, -1e+30 }
 0x165   : > { %v173_v14 = vsel %vm124_vm1, %v172_v13, -inf }
 0x166   : > { %174 = vmax.xlane.f32.xlu0 %v173_v14 }
 0x17c   : > { %460 = vrot.lane.b32.xlu0 %v822_v2, %s779_s15 }
 0x1f3   : > { %v175_v17 = vpop.xlane.xlu0 %174 }
 0x1f4   : > { %v176_v18 = vsub.f32 %v172_v13, %v175_v17 }
 0x1f6   : > { %v177_v19 = vmul.f32 1.442695, %v176_v18 }
 0x1f7   : > { %v461_v31 = vpop.permute.xlu0 %460 }
 0x1f8   : > { %750 = vpow2.f32 %v177_v19  ;;  %v466_v33 = vsel %vm124_vm1, %v461_v31, 0 }
 0x202   : > { %v751_v20 = vpop.eup %750 }
 0x203   : > { %v179_v21 = vsel %vm124_vm1, %v751_v20, 0.0 }
 0x204   : > { %180 = vadd.xlane.f32.xlu1 %v179_v21 }
 0x215   : > { %234 = vrot.lane.b32.xlu1 %v822_v2, %s780_s16 }
 0x219   : > { %348 = vrot.lane.b32.xlu1 %v822_v2, %s781_s17 }
 0x21d   : > { %346 = vrot.lane.b32.xlu1 %v822_v2, %s782_s18 }
 0x221   : > { %458 = vrot.lane.b32.xlu1 %v822_v2, %s783_s19 }
 0x291   : > { %v181_v23 = vpop.xlane.xlu1 %180 }
 0x292   : > { %752 = vrcp.f32 %v181_v23 }
 0x295   : > { %v235_v26 = vpop.permute.xlu1 %234 }
 0x299   : > { %v349_v29 = vpop.permute.xlu1 %348 }
 0x29a   : > { %v354_v30 = vsel %vm124_vm1, %v349_v29, 0 }
 0x29c   : > { %v753_v24 = vpop.eup %752 }
 0x29d   : > { %v183_v25 = vmul.f32 %v753_v24, %v751_v20  ;;  %v347_v32 = vpop.permute.xlu1 %346 }
 0x29f   : > { %v184_v27 = vpack.c.bf16 %v183_v25, %v183_v25 }
 0x2a1   : > { %686 = vmatmul.mubr.msk.bf16.vlgmr.msra.gmra.mrb[0].mxu1 %vm124_vm1, %v184_v27  ;;  %v459_v34 = vpop.permute.xlu1 %458 }
 0x2a2   : > { %690 = vmatpush3.bf16.xpose.msra.mxu1 %v242_v28  ;;  %691 = vmatprep.mubr.msk.bf16.mxu1 %vm775_vm0, %v774_v0 }
 0x2a3   : > { %701 = vmatprep.subr.bf16.mxu1 %v774_v0 }
 0x2a9   : > { %692 = vmatmul.mubr.msk.bf16.vlgmr.msra.gmra.mrb[4].mxu1 %vm124_vm1, %v235_v26 }
 0x2aa   : > { %702 = vmatpush3.bf16.xpose.msra.mxu1 %v354_v30  ;;  %703 = vmatprep.mubr.msk.bf16.mxu1 %vm775_vm0, %v774_v0 }
 0x2ab   : > { %713 = vmatprep.subr.bf16.mxu1 %v774_v0 }
 0x2b1   : > { %704 = vmatmul.mubr.msk.bf16.vlgmr.msra.gmra.mrb[8].mxu1 %vm124_vm1, %v347_v32 }
 0x2b2   : > { %714 = vmatpush3.bf16.xpose.msra.mxu1 %v466_v33  ;;  %715 = vmatprep.mubr.msk.bf16.mxu1 %vm775_vm0, %v774_v0 }
 0x2b9   : > { %716 = vmatmul.mubr.msk.bf16.vlgmr.msra.gmra.mrb[12].mxu1 %vm124_vm1, %v459_v34 }
 0x374   : > { %v865_v35 = vpop.f32.mrb[0].mxu1 }
 0x375   : > { %v687_v36 = vpop.f32.mrb[1].mxu1 }
 0x376   : > { %v231_v37 = vpop.f32.mrb[2].mxu1 }
 0x377   : > { %v688_v38 = vpop.f32.mrb[3].mxu1 }
 0x37c   : > { %v278_v39 = vpop.f32.mrb[4].mxu1 }
 0x37d   : > { %v284_v40 = vmul.f32 0.35355338, %v278_v39  ;;  %v693_v41 = vpop.f32.mrb[5].mxu1 }
 0x37e   : > { %v281_v42 = vpop.f32.mrb[6].mxu1 }
 0x37f   : > { %v694_v43 = vpop.f32.mrb[7].mxu1  ;;  %v285_v44 = vsel %vm118_vm2, %v284_v40, -1e+30 }
 0x380   : > { %v286_v45 = vsel %vm124_vm1, %v285_v44, -inf }
 0x381   : > { %287 = vmax.xlane.f32.xlu1 %v286_v45 }
 0x384   : > { %v390_v46 = vpop.f32.mrb[8].mxu1 }
 0x385   : > { %v396_v47 = vmul.f32 0.35355338, %v390_v46  ;;  %v705_v48 = vpop.f32.mrb[9].mxu1 }
 0x386   : > { %v393_v49 = vpop.f32.mrb[10].mxu1 }
 0x387   : > { %v397_v50 = vsel %vm118_vm2, %v396_v47, -1e+30  ;;  %v706_v51 = vpop.f32.mrb[11].mxu1 }
 0x388   : > { %v398_v52 = vsel %vm124_vm1, %v397_v50, -inf }
 0x389   : > { %399 = vmax.xlane.f32.xlu0 %v398_v52 }
 0x38c   : > { %v502_v53 = vpop.f32.mrb[12].mxu1 }
 0x38d   : > { %v508_v54 = vmul.f32 0.35355338, %v502_v53  ;;  %v717_v55 = vpop.f32.mrb[13].mxu1 }
 0x38e   : > { %v505_v56 = vpop.f32.mrb[14].mxu1 }
 0x38f   : > { %v509_v57 = vsel %vm118_vm2, %v508_v54, -1e+30  ;;  %v718_v58 = vpop.f32.mrb[15].mxu1 }
 0x390   : > { %v510_v59 = vsel %vm124_vm1, %v509_v57, -inf }
 0x391   : > { %511 = vmax.xlane.f32.xlu1 %v510_v59 }
 0x40e   : > { %v288_v60 = vpop.xlane.xlu1 %287 }
 0x40f   : > { %v289_v61 = vsub.f32 %v285_v44, %v288_v60 }
 0x411   : > { %v290_v62 = vmul.f32 1.442695, %v289_v61 }
 0x413   : > { %754 = vpow2.f32 %v290_v62 }
 0x416   : > { %v400_v7 = vpop.xlane.xlu0 %399 }
 0x417   : > { %v401_v9 = vsub.f32 %v397_v50, %v400_v7 }
 0x419   : > { %v402_v10 = vmul.f32 1.442695, %v401_v9 }
 0x41d   : > { %v755_v63 = vpop.eup %754 }
 0x41e   : > { %v512_v1 = vpop.xlane.xlu1 %511  ;;  %v292_v3 = vsel %vm124_vm1, %v755_v63, 0.0 }
 0x41f   : > { %v513_v4 = vsub.f32 %v509_v57, %v512_v1  ;;  %293 = vadd.xlane.f32.xlu1 %v292_v3 }
 0x421   : > { %v514_v5 = vmul.f32 1.442695, %v513_v4 }
 0x423   : > { %756 = vpow2.f32 %v514_v5 }
 0x424   : > { %758 = vpow2.f32 %v402_v10 }
 0x42d   : > { %v757_v8 = vpop.eup %756 }
 0x42e   : > { %v516_v6 = vsel %vm124_vm1, %v757_v8, 0.0  ;;  %v759_v11 = vpop.eup %758 }
 0x42f   : > { %517 = vadd.xlane.f32.xlu0 %v516_v6  ;;  %v404_v12 = vsel %vm124_vm1, %v759_v11, 0.0 }
 0x430   : > { %298 = vrot.lane.b32.xlu1 %v822_v2, %s784_s20 }
 0x445   : > { %410 = vrot.lane.b32.xlu0 %v822_v2, %s785_s21 }
 0x454   : > { %405 = vadd.xlane.f32.xlu1 %v404_v12 }
 0x465   : > { %522 = vrot.lane.b32.xlu1 %v822_v2, %s786_s22 }
 0x4ac   : > { %v294_v13 = vpop.xlane.xlu1 %293 }
 0x4ad   : > { %760 = vrcp.f32 %v294_v13 }
 0x4b0   : > { %v299_v14 = vpop.permute.xlu1 %298 }
 0x4b1   : > { %v304_v15 = vsel %vm190_vm3, %v299_v14, 0 }
 0x4b2   : > { %696 = vmatpush3.bf16.msra.mxu0 %v304_v15 }
 0x4b3   : > { %707 = vmatprep.subr.bf16.mxu0 %v774_v0 }
 0x4b7   : > { %v761_v16 = vpop.eup %760 }
 0x4b8   : > { %v296_v17 = vmul.f32 %v761_v16, %v755_v63 }
 0x4ba   : > { %v297_v18 = vpack.c.bf16 %v296_v17, %v296_v17 }
 0x4bc   : > { %698 = vmatmul.mubr.msk.bf16.vlgmr.msra.gmra.mrb[4].mxu0 %vm124_vm1, %v297_v18  ;;  %v518_v19 = vpop.xlane.xlu0 %517 }
 0x4bd   : > { %709 = vmatprep.mubr.msk.bf16.mxu0 %vm775_vm0, %v774_v0 }
 0x4c0   : > { %v411_v20 = vpop.permute.xlu0 %410 }
 0x4c1   : > { %v416_v2 = vsel %vm190_vm3, %v411_v20, 0 }
 0x4c2   : > { %708 = vmatpush3.bf16.msra.mxu0 %v416_v2 }
 0x4c3   : > { %719 = vmatprep.subr.bf16.mxu0 %v774_v0 }
 0x4e1   : > { %v406_v21 = vpop.xlane.xlu1 %405 }
 0x4e2   : > { %762 = vrcp.f32 %v406_v21 }
 0x4e3   : > { %764 = vrcp.f32 %v518_v19 }
 0x4e5   : > { %v523_v23 = vpop.permute.xlu1 %522 }
 0x4e6   : > { %v528_v25 = vsel %vm190_vm3, %v523_v23, 0 }
 0x4ec   : > { %v763_v22 = vpop.eup %762 }
 0x4ed   : > { %v408_v24 = vmul.f32 %v763_v22, %v759_v11  ;;  %v765_v27 = vpop.eup %764 }
 0x4ee   : > { %v520_v28 = vmul.f32 %v765_v27, %v757_v8 }
 0x4ef   : > { %v409_v26 = vpack.c.bf16 %v408_v24, %v408_v24 }
 0x4f0   : > { %v521_v29 = vpack.c.bf16 %v520_v28, %v520_v28 }
 0x4f1   : > { %710 = vmatmul.mubr.msk.bf16.vlgmr.msra.gmra.mrb[8].mxu0 %vm124_vm1, %v409_v26 }
 0x4f2   : > { %720 = vmatpush3.bf16.msra.mxu0 %v528_v25  ;;  %721 = vmatprep.mubr.msk.bf16.mxu0 %vm775_vm0, %v774_v0 }
 0x4f9   : > { %722 = vmatmul.mubr.msk.bf16.vlgmr.msra.gmra.mrb[12].mxu0 %vm124_vm1, %v521_v29 }
 0x58f   : > { %v340_v30 = vpop.f32.mrb[4].mxu0 }
 0x590   : > { %571 = vrot.lane.b32.xlu1 %v340_v30, %s787_s23  ;;  %v699_v31 = vpop.f32.mrb[5].mxu0 }
 0x591   : > { %v343_v32 = vpop.f32.mrb[6].mxu0 }
 0x592   : > { %v700_v33 = vpop.f32.mrb[7].mxu0 }
 0x5c4   : > { %v452_v34 = vpop.f32.mrb[8].mxu0 }
 0x5c5   : > { %575 = vrot.lane.b32.xlu0 %v452_v34, %s788_s24  ;;  %v711_v36 = vpop.f32.mrb[9].mxu0 }
 0x5c6   : > { %v455_v37 = vpop.f32.mrb[10].mxu0 }
 0x5c7   : > { %v712_v38 = vpop.f32.mrb[11].mxu0 }
 0x5cc   : > { %v564_v39 = vpop.f32.mrb[12].mxu0 }
 0x5cd   : > { %579 = vrot.lane.b32.xlu1 %v564_v39, %s789_s25  ;;  %v723_v0 = vpop.f32.mrb[13].mxu0 }
 0x5ce   : > { %v567_v40 = vpop.f32.mrb[14].mxu0 }
 0x5cf   : > { %v724_v41 = vpop.f32.mrb[15].mxu0 }
 0x602   : > { %v572_v42 = vpop.permute.xlu1 %571 }
 0x603   : > { %v582_v44 = vsel %vm124_vm1, %v865_v35, %v572_v42 }
 0x637   : > { %v576_v43 = vpop.permute.xlu0 %575 }
 0x638   : > { %v584_v45 = vsel %vm583_vm4, %v582_v44, %v576_v43 }
 0x63f   : > { %v580_v46 = vpop.permute.xlu1 %579 }
 0x640   : > { %v586_v47 = vsel %vm585_vm5, %v584_v45, %v580_v46 }
 0x641   : > { %v587_v48 = vpack.c.bf16 %v586_v47, %v586_v47 }
 0x643   : > { %589 = vst.msk [vmem:[%s111_s28] sm:$0xf] %vm588_vm6, %v587_v48 }
 0x644 PF: > { %s11_s6 = sadd.s32 1, %s772_s6  }
 0x645   : > { %p8_p4 = scmp.ge.s32.totalorder %s11_s6, 4  }
 0x647   :  { %10 = sbr.rel (!%p8_p4) target bundleno = 1 (0x1), region = 54 }

// kernel: run.15
= control target key start
LH: loop header
LB: loop body
LE: loop exit
PB: predicated region body
PF: predicated region fallthrough
CT: control target
= control target key end

     0   :  { %vm35_vm0 = vcmask 261120   ;;  %v368_v16 = vmov 0.0   ;;  %vm369_vm1 = vmmov 0   ;;  %v63_v22 = vlaneseq  ;;  %s482_s0 = inlined_call_operand.vmem [shape: bf16[16,32], index: 0, kind: input, shape index: {}]   ;;  %s483_s3 = inlined_call_operand.vmem [shape: bf16[32,128], index: 3, kind: input, shape index: {}]   ;;  %s484_s1 = inlined_call_operand.vmem [shape: bf16[1,32], index: 1, kind: input, shape index: {}]   ;;  %s485_s2 = inlined_call_operand.vmem [shape: bf16[1,32], index: 2, kind: input, shape index: {}]   ;;  %s486_s5 = inlined_call_operand.vmem [shape: bf16[128,32], index: 5, kind: input, shape index: {}]   ;;  %s487_s4 = inlined_call_operand.vmem [shape: bf16[1,128], index: 4, kind: input, shape index: {}]   ;;  %s488_s6 = inlined_call_operand.vmem [shape: bf16[1,32], index: 6, kind: input, shape index: {}]   ;;  %s489_s7 = inlined_call_operand.vmem [shape: bf16[16,32], index: 7, kind: output, shape index: {}]  }
   0x1   :  { %v305_v0 = vld [vmem:[%s482_s0] sm:$0xff]   ;;  %320 = vmatprep.subr.bf16.mxu0 %v368_v16  ;;  %328 = vmatprep.subr.bf16.mxu1 %v368_v16  ;;  %v351_v17 = vld [vmem:[%s483_s3 + $0x8] sm:$0xff]   ;;  %v354_v44 = vld [vmem:[%s486_s5 + $0x10] sm:$0xff]   ;;  %vm282_vm2 = vcmask 257024  }
   0x2   :  { %v413_v1 = vunpack.c.l.bf16 %v305_v0  ;;  %v415_v2 = vunpack.c.h.bf16 %v305_v0  ;;  %v350_v15 = vld [vmem:[%s483_s3] sm:$0xff]   ;;  %324 = vmatprep.mubr.msk.bf16.mxu0 %vm369_vm1, %v368_v16  ;;  %344 = vmatprep.mubr.msk.bf16.mxu1 %vm369_vm1, %v368_v16  ;;  %v64_v25 = vshrl.u32 %v63_v22, 7  ;;  %v353_v43 = vld [vmem:[%s486_s5 + $0x8] sm:$0xff]   ;;  %v355_v45 = vld [vmem:[%s486_s5 + $0x18] sm:$0xff]  }
   0x3   :  { %321 = vmatpush3.bf16.msra.mxu0 %v350_v15  ;;  %v31_v26 = vld [vmem:[%s484_s1] sm:$0x1]  ;;  %v357_v47 = vld [vmem:[%s486_s5 + $0x28] sm:$0xff]   ;;  %v358_v48 = vld [vmem:[%s486_s5 + $0x30] sm:$0xff]  }
   0x4   :  { %v36_v3 = vsel %vm35_vm0, %v413_v1, 0.0  ;;  %v39_v4 = vsel %vm35_vm0, %v415_v2, 0.0  ;;  %322 = vmatprep.subr.bf16.mxu0 %v368_v16  ;;  %v32_v27 = vunpack.c.l.bf16 %v31_v26  ;;  %v434_v28 = vsub.s32 0, %v64_v25  ;;  %v33_v29 = vld [vmem:[%s485_s2] sm:$0x1]  ;;  %v359_v49 = vld [vmem:[%s486_s5 + $0x38] sm:$0xff]  }
   0x5   :  { %37 = vadd.xlane.f32.xlu0 %v36_v3  ;;  %v34_v32 = vunpack.c.l.bf16 %v33_v29  ;;  %v352_v42 = vld [vmem:[%s486_s5] sm:$0xff]  }
   0x6   :  { %v66_v33 = vrot.slane %v32_v27, %v434_v28  ;;  %329 = vmatpush3.bf16.msra.mxu1 %v352_v42  ;;  %v356_v46 = vld [vmem:[%s486_s5 + $0x20] sm:$0xff]  }
   0x7   :  { %323 = vmatpush3.bf16.msra.mxu0 %v351_v17  ;;  %v72_v37 = vrot.slane %v34_v32, %v434_v28  ;;  %330 = vmatprep.subr.bf16.mxu1 %v368_v16  ;;  %v80_v50 = vld [vmem:[%s487_s4] sm:$0x1] }
   0x8   :  { %v81_v51 = vunpack.c.l.bf16 %v80_v50 }
   0x9   :  { %40 = vadd.xlane.f32.xlu0 %v39_v4 }
   0xa   :  { %331 = vmatpush3.bf16.msra.mxu1 %v353_v43  ;;  %v85_v52 = vrot.slane %v81_v51, %v434_v28 }
   0xb   :  { %332 = vmatprep.subr.bf16.mxu1 %v368_v16 }
   0xe   :  { %333 = vmatpush3.bf16.msra.mxu1 %v354_v44 }
   0xf   :  { %334 = vmatprep.subr.bf16.mxu1 %v368_v16 }
  0x12   :  { %335 = vmatpush3.bf16.msra.mxu1 %v355_v45 }
  0x13   :  { %336 = vmatprep.subr.bf16.mxu1 %v368_v16 }
  0x16   :  { %337 = vmatpush3.bf16.msra.mxu1 %v356_v46 }
  0x17   :  { %338 = vmatprep.subr.bf16.mxu1 %v368_v16 }
  0x1a   :  { %339 = vmatpush3.bf16.msra.mxu1 %v357_v47 }
  0x1b   :  { %340 = vmatprep.subr.bf16.mxu1 %v368_v16 }
  0x1e   :  { %341 = vmatpush3.bf16.msra.mxu1 %v358_v48 }
  0x1f   :  { %342 = vmatprep.subr.bf16.mxu1 %v368_v16  ;;  %v177_v16 = vld [vmem:[%s488_s6] sm:$0x1] }
  0x20   :  { %v178_v17 = vunpack.c.l.bf16 %v177_v16 }
  0x22   :  { %343 = vmatpush3.bf16.msra.mxu1 %v359_v49 }
  0x92   :  { %v38_v5 = vpop.xlane.xlu0 %37 }
  0x93   :  { %v43_v6 = vmul.f32 0.03125, %v38_v5 }
  0x95   :  { %v45_v7 = vsub.f32 %v413_v1, %v43_v6 }
  0x96   :  { %v41_v8 = vpop.xlane.xlu0 %40 }
  0x97   :  { %v44_v9 = vmul.f32 0.03125, %v41_v8  ;;  %v47_v10 = vmul.f32 %v45_v7, %v45_v7 }
  0x99   :  { %v46_v11 = vsub.f32 %v415_v2, %v44_v9  ;;  %v49_v12 = vsel %vm35_vm0, %v47_v10, 0.0 }
  0x9a   :  { %50 = vadd.xlane.f32.xlu1 %v49_v12 }
  0x9b   :  { %v48_v13 = vmul.f32 %v46_v11, %v46_v11 }
  0x9d   :  { %v52_v14 = vsel %vm35_vm0, %v48_v13, 0.0 }
  0x9e   :  { %53 = vadd.xlane.f32.xlu1 %v52_v14 }
 0x127   :  { %v51_v18 = vpop.xlane.xlu1 %50 }
 0x128   :  { %v55_v19 = vmul.f32 0.03125, %v51_v18  ;;  %v182_v18 = vrot.slane %v178_v17, %v434_v28 }
 0x12a   :  { %v57_v20 = vadd.f32 1e-05, %v55_v19 }
 0x12b   :  { %v54_v21 = vpop.xlane.xlu1 %53 }
 0x12c   :  { %360 = vrsqrt.f32 %v57_v20  ;;  %v56_v23 = vmul.f32 0.03125, %v54_v21 }
 0x12e   :  { %v58_v24 = vadd.f32 1e-05, %v56_v23 }
 0x130   :  { %362 = vrsqrt.f32 %v58_v24 }
 0x136   :  { %v361_v30 = vpop.eup %360 }
 0x137   :  { %v61_v31 = vmul.f32 %v361_v30, %v45_v7 }
 0x139   :  { %v67_v36 = vmul.f32 %v66_v33, %v61_v31 }
 0x13a   :  { %v363_v34 = vpop.eup %362 }
 0x13b   :  { %v62_v35 = vmul.f32 %v363_v34, %v46_v11  ;;  %v73_v39 = vadd.f32 %v72_v37, %v67_v36 }
 0x13d   :  { %v68_v38 = vmul.f32 %v66_v33, %v62_v35 }
 0x13f   :  { %v74_v40 = vadd.f32 %v72_v37, %v68_v38 }
 0x141   :  { %v75_v41 = vpack.c.bf16 %v74_v40, %v73_v39 }
 0x143   :  { %325 = vmatmul.mubr.msk.bf16.vlgmr.msra.gmra.mrb[0].mxu0 %vm35_vm0, %v75_v41 }
 0x216   :  { %v135_v53 = vpop.f32.mrb[0].mxu0 }
 0x217   :  { %v136_v54 = vadd.f32 %v135_v53, %v85_v52  ;;  %v326_v55 = vpop.f32.mrb[1].mxu0 }
 0x218   :  { %v138_v56 = vpop.f32.mrb[2].mxu0 }
 0x219   :  { %v144_v57 = vmul.f32 0.044715, %v136_v54  ;;  %v139_v58 = vadd.f32 %v138_v56, %v85_v52  ;;  %v327_v59 = vpop.f32.mrb[3].mxu0  ;;  %v142_v10 = vmul.f32 0.5, %v136_v54 }
 0x21b   :  { %v146_v60 = vmul.f32 %v144_v57, %v136_v54  ;;  %v145_v61 = vmul.f32 0.044715, %v139_v58  ;;  %v143_v11 = vmul.f32 0.5, %v139_v58 }
 0x21d   :  { %v148_v62 = vmul.f32 %v146_v60, %v136_v54  ;;  %v147_v63 = vmul.f32 %v145_v61, %v139_v58 }
 0x21f   :  { %v149_v0 = vmul.f32 %v147_v63, %v139_v58  ;;  %v150_v3 = vadd.f32 %v148_v62, %v136_v54 }
 0x221   :  { %v151_v4 = vadd.f32 %v149_v0, %v139_v58  ;;  %v152_v5 = vmul.f32 0.7978846, %v150_v3 }
 0x223   :  { %v153_v6 = vmul.f32 0.7978846, %v151_v4  ;;  %364 = vtanh.f32 %v152_v5 }
 0x225   :  { %366 = vtanh.f32 %v153_v6 }
 0x22d   :  { %v365_v7 = vpop.eup %364 }
 0x22e   :  { %v156_v8 = vadd.f32 1.0, %v365_v7 }
 0x22f   :  { %v367_v9 = vpop.eup %366 }
 0x230   :  { %v157_v12 = vadd.f32 1.0, %v367_v9  ;;  %v158_v13 = vmul.f32 %v156_v8, %v142_v10 }
 0x232   :  { %v159_v14 = vmul.f32 %v157_v12, %v143_v11 }
 0x234   :  { %v160_v15 = vpack.c.bf16 %v159_v14, %v158_v13 }
 0x236   :  { %345 = vmatmul.mubr.bf16.vlgmr.msra.gmra.mrb[0].mxu1 %v160_v15 }
 0x309   :  { %v265_v19 = vpop.f32.mrb[0].mxu1 }
 0x30a   :  { %v266_v20 = vadd.f32 %v265_v19, %v182_v18  ;;  %v346_v21 = vpop.f32.mrb[1].mxu1 }
 0x30b   :  { %v268_v22 = vpop.f32.mrb[2].mxu1 }
 0x30c   :  { %v272_v23 = vadd.f32 %v413_v1, %v266_v20  ;;  %v269_v24 = vadd.f32 %v268_v22, %v182_v18  ;;  %v347_v25 = vpop.f32.mrb[3].mxu1 }
 0x30e   :  { %v302_v26 = vpack.c.bf16 %v272_v23, %v272_v23  ;;  %v273_v27 = vadd.f32 %v415_v2, %v269_v24 }
 0x310   :  { %283 = vst.msk [vmem:[%s489_s7] sm:$0xf] %vm282_vm2, %v302_v26  ;;  %v303_v29 = vpack.c.bf16 %v273_v27, %v273_v27 }
 0x312   :  { %284 = vst.msk [vmem:[%s489_s7 + $0x4] sm:$0xf] %vm282_vm2, %v303_v29 }

// kernel: run.20
= control target key start
LH: loop header
LB: loop body
LE: loop exit
PB: predicated region body
PF: predicated region fallthrough
CT: control target
= control target key end

     0   :  { %vm28_vm0 = vcmask 261120   ;;  %v192_v16 = vmov 0.0   ;;  %vm193_vm1 = vmmov 0   ;;  %v56_v20 = vlaneseq  ;;  %s256_s0 = inlined_call_operand.vmem [shape: bf16[16,32], index: 0, kind: input, shape index: {}]   ;;  %s257_s3 = inlined_call_operand.vmem [shape: bf16[32,64], index: 3, kind: input, shape index: {}]   ;;  %s258_s1 = inlined_call_operand.vmem [shape: bf16[1,32], index: 1, kind: input, shape index: {}]   ;;  %s259_s2 = inlined_call_operand.vmem [shape: bf16[1,32], index: 2, kind: input, shape index: {}]   ;;  %s260_s4 = inlined_call_operand.vmem [shape: bf16[16,32], index: 4, kind: output, shape index: {0}]   ;;  %s261_s5 = inlined_call_operand.vmem [shape: bf16[16,64], index: 5, kind: output, shape index: {1}]  }
   0x1   :  { %v170_v0 = vld [vmem:[%s256_s0] sm:$0xff]   ;;  %176 = vmatprep.subr.bf16.mxu0 %v192_v16  ;;  %v187_v17 = vld [vmem:[%s257_s3 + $0x8] sm:$0xff]   ;;  %180 = vmatprep.mubr.msk.bf16.mxu0 %vm193_vm1, %v192_v16  ;;  %vm76_vm2 = vcmask 257024   ;;  %vm147_vm3 = vcmask 519168  }
   0x2   :  { %v171_v1 = vunpack.c.l.bf16 %v170_v0  ;;  %v172_v2 = vunpack.c.h.bf16 %v170_v0  ;;  %v186_v15 = vld [vmem:[%s257_s3] sm:$0xff]   ;;  %v57_v24 = vshrl.u32 %v56_v20, 7 }
   0x3   :  { %177 = vmatpush3.bf16.msra.mxu0 %v186_v15  ;;  %v24_v26 = vld [vmem:[%s258_s1] sm:$0x1] }
   0x4   :  { %v29_v3 = vsel %vm28_vm0, %v171_v1, 0.0  ;;  %v32_v4 = vsel %vm28_vm0, %v172_v2, 0.0  ;;  %178 = vmatprep.subr.bf16.mxu0 %v192_v16  ;;  %v26_v27 = vld [vmem:[%s259_s2] sm:$0x1]  ;;  %v25_v28 = vunpack.c.l.bf16 %v24_v26  ;;  %v58_v29 = vsub.s32 0, %v57_v24 }
   0x5   :  { %30 = vadd.xlane.f32.xlu0 %v29_v3  ;;  %v27_v30 = vunpack.c.l.bf16 %v26_v27 }
   0x6   :  { %v59_v31 = vrot.slane %v25_v28, %v58_v29 }
   0x7   :  { %179 = vmatpush3.bf16.msra.mxu0 %v187_v17  ;;  %v65_v34 = vrot.slane %v27_v30, %v58_v29 }
   0x9   :  { %33 = vadd.xlane.f32.xlu0 %v32_v4 }
  0x92   :  { %v31_v5 = vpop.xlane.xlu0 %30 }
  0x93   :  { %v36_v6 = vmul.f32 0.03125, %v31_v5 }
  0x95   :  { %v38_v7 = vsub.f32 %v171_v1, %v36_v6 }
  0x96   :  { %v34_v8 = vpop.xlane.xlu0 %33 }
  0x97   :  { %v37_v9 = vmul.f32 0.03125, %v34_v8  ;;  %v40_v10 = vmul.f32 %v38_v7, %v38_v7 }
  0x99   :  { %v39_v11 = vsub.f32 %v172_v2, %v37_v9  ;;  %v42_v12 = vsel %vm28_vm0, %v40_v10, 0.0 }
  0x9a   :  { %43 = vadd.xlane.f32.xlu1 %v42_v12 }
  0x9b   :  { %v41_v13 = vmul.f32 %v39_v11, %v39_v11 }
  0x9d   :  { %v45_v14 = vsel %vm28_vm0, %v41_v13, 0.0 }
  0x9e   :  { %46 = vadd.xlane.f32.xlu1 %v45_v14 }
 0x127   :  { %v44_v18 = vpop.xlane.xlu1 %43 }
 0x128   :  { %v48_v19 = vmul.f32 0.03125, %v44_v18 }
 0x12a   :  { %v50_v21 = vadd.f32 1e-05, %v48_v19 }
 0x12b   :  { %v47_v22 = vpop.xlane.xlu1 %46 }
 0x12c   :  { %188 = vrsqrt.f32 %v50_v21  ;;  %v49_v23 = vmul.f32 0.03125, %v47_v22 }
 0x12e   :  { %v51_v25 = vadd.f32 1e-05, %v49_v23 }
 0x130   :  { %190 = vrsqrt.f32 %v51_v25 }
 0x136   :  { %v189_v32 = vpop.eup %188 }
 0x137   :  { %v54_v33 = vmul.f32 %v189_v32, %v38_v7 }
 0x139   :  { %v60_v35 = vmul.f32 %v59_v31, %v54_v33 }
 0x13a   :  { %v191_v36 = vpop.eup %190 }
 0x13b   :  { %v55_v37 = vmul.f32 %v191_v36, %v39_v11  ;;  %v66_v38 = vadd.f32 %v65_v34, %v60_v35 }
 0x13d   :  { %v61_v39 = vmul.f32 %v59_v31, %v55_v37  ;;  %v165_v40 = vpack.c.bf16 %v66_v38, %v66_v38 }
 0x13f   :  { %v67_v41 = vadd.f32 %v65_v34, %v61_v39  ;;  %77 = vst.msk [vmem:[%s260_s4] sm:$0xf] %vm76_vm2, %v165_v40 }
 0x141   :  { %v68_v42 = vpack.c.bf16 %v67_v41, %v66_v38  ;;  %v166_v43 = vpack.c.bf16 %v67_v41, %v67_v41 }
 0x143   :  { %78 = vst.msk [vmem:[%s260_s4 + $0x4] sm:$0xf] %vm76_vm2, %v166_v43  ;;  %181 = vmatmul.mubr.msk.bf16.vlgmr.msra.gmra.mrb[0].mxu0 %vm28_vm0, %v68_v42 }
 0x216   :  { %v132_v44 = vpop.f32.mrb[0].mxu0 }
 0x217   :  { %v167_v45 = vpack.c.bf16 %v132_v44, %v132_v44  ;;  %v182_v46 = vpop.f32.mrb[1].mxu0 }
 0x218   :  { %v135_v47 = vpop.f32.mrb[2].mxu0 }
 0x219   :  { %148 = vst.msk [vmem:[%s261_s5] sm:$0xf] %vm147_vm3, %v167_v45  ;;  %v168_v48 = vpack.c.bf16 %v135_v47, %v135_v47  ;;  %v183_v49 = vpop.f32.mrb[3].mxu0 }
 0x21b   :  { %149 = vst.msk [vmem:[%s261_s5 + $0x4] sm:$0xf] %vm147_vm3, %v168_v48 }

// kernel: run.21
= control target key start
LH: loop header
LB: loop body
LE: loop exit
PB: predicated region body
PF: predicated region fallthrough
CT: control target
= control target key end

     0   :  { %v119_v0 = vmov 0.0   ;;  %vm120_vm0 = vmmov 0   ;;  %vm38_vm1 = vcmask 261120   ;;  %v90_v4 = vlaneseq  ;;  %s156_s1 = inlined_call_operand.vmem [shape: bf16[32,128], index: 1, kind: input, shape index: {}]   ;;  %s157_s0 = inlined_call_operand.vmem [shape: bf16[2,32], index: 0, kind: input, shape index: {}]   ;;  %s158_s2 = inlined_call_operand.vmem [shape: bf16[1,128], index: 2, kind: input, shape index: {}]   ;;  %s159_s3 = inlined_call_operand.vmem [shape: bf16[2,128], index: 3, kind: output, shape index: {}]  }
   0x1   :  { %107 = vmatprep.subr.bf16.mxu0 %v119_v0  ;;  %19 = vst [vmem:[#allocation2] sm:$0x3] %v119_v0  ;;  %v117_v1 = vld [vmem:[%s156_s1] sm:$0xff]   ;;  %111 = vmatprep.mubr.msk.bf16.mxu0 %vm120_vm0, %v119_v0  ;;  %v118_v2 = vld [vmem:[%s156_s1 + $0x8] sm:$0xff]  }
   0x2   :  { %108 = vmatpush3.bf16.msra.mxu0 %v117_v1  ;;  %v21_v3 = vld [vmem:[%s157_s0] sm:$0x1]  ;;  %v91_v6 = vshrl.u32 %v90_v4, 7 }
   0x3   :  { %109 = vmatprep.subr.bf16.mxu0 %v119_v0  ;;  %v88_v8 = vld [vmem:[%s158_s2] sm:$0x1] }
   0x4   :  { %v89_v12 = vunpack.c.l.bf16 %v88_v8  ;;  %v92_v13 = vsub.s32 0, %v91_v6 }
   0x6   :  { %110 = vmatpush3.bf16.msra.mxu0 %v118_v2  ;;  %v93_v15 = vrot.slane %v89_v12, %v92_v13 }
   0x8   :  { %v20_v5 = vld [vmem:[#allocation2] sm:$0x3] }
   0x9   :  { %112 = vmatmul.mubr.msk.bf16.vlgmr.msra.gmra.mrb[0].mxu0 %vm38_vm1, %v21_v3 }
  0xdc   :  { %v76_v7 = vpop.f32.mrb[0].mxu0 }
  0xdd   :  { %v82_v9 = vadd.f32 %v76_v7, %v20_v5  ;;  %v113_v10 = vpop.f32.mrb[1].mxu0 }
  0xde   :  { %v79_v11 = vpop.f32.mrb[2].mxu0 }
  0xdf   :  { %83 = vst [vmem:[#allocation2] sm:$0x3] %v82_v9  ;;  %v114_v14 = vpop.f32.mrb[3].mxu0 }
  0xe6   :  { %v87_v16 = vld [vmem:[#allocation2] sm:$0x3] }
  0xe7   :  { %v94_v17 = vadd.f32 %v93_v15, %v87_v16 }
  0xe9   :  { %v95_v18 = vpack.c.bf16 %v94_v17, %v94_v17 }
  0xeb   :  { %96 = vst [vmem:[%s159_s3] sm:$0x1] %v95_v18 }

// kernel: run.23
= control target key start
LH: loop header
LB: loop body
LE: loop exit
PB: predicated region body
PF: predicated region fallthrough
CT: control target
= control target key end

     0   :  { %9 = vsyncpa [#allocation5], 0  ;;  %vm25_vm0 = vcmask 23552   ;;  %v183_v2 = vmov 0   ;;  %s246_s0 = inlined_call_operand.vmem [shape: bf16[8,3], index: 0, kind: input, shape index: {}]   ;;  %s247_s1 = inlined_call_operand.vmem [shape: s32[8,1], index: 1, kind: input, shape index: {}]   ;;  %s248_s2 = inlined_call_operand.hbm [shape: f32[1,1], index: 2, kind: output, shape index: {0}]   ;;  %s249_s3 = inlined_call_operand.hbm [shape: f32[1,1], index: 3, kind: output, shape index: {1}]  }
   0x1   :  { %v22_v0 = vld [vmem:[%s246_s0] sm:$0xf]  ;;  %130 = vset.pattern.permute.xlu0 %v183_v2 }
   0x2   :  { %v23_v1 = vunpack.c.l.bf16 %v22_v0 }
   0x3   :  { %10 = vsyncpa [#allocation7], 0  ;;  %v24_v4 = vld [vmem:[%s247_s1] sm:$0xff]  ;;  %vm19_vm1 = vcmask 0   ;;  %v184_v5 = vmov 0.0   ;;  %v38_v8 = vlaneseq  ;;  %vm56_vm4 = vcmask 7168  }
   0x4   :  { %v26_v3 = vsel %vm25_vm0, %v23_v1, -inf  ;;  %20 = vst.msk [vmem:[#allocation2] sm:$0x1] %vm19_vm1, %v184_v5  ;;  %21 = vst.msk [vmem:[#allocation3] sm:$0x1] %vm19_vm1, %v184_v5  ;;  %vm50_vm3 = vcmp.ne.s32.totalorder %v24_v4, 4294967196 }
   0x5   :  { %27 = vmax.xlane.f32.xlu0 %v26_v3  ;;  %v39_v10 = vand.u32 127, %v38_v8  ;;  %v121_v22 = vsel %vm50_vm3, 1.0, %v184_v5  ;;  %s185_s16 = smov [#allocation4]   ;;  %s186_s18 = smov [#allocation6]  }
   0x6   :  { %v72_v26 = vsel %vm56_vm4, %v121_v22, 0.0  ;;  %s98_s17 = sshll.u32 %s185_s16, 4  ;;  %s108_s19 = sshll.u32 %s186_s18, 4  ;;  %s99_s17 = int_to_ptr.vmem [resolvable:$true] %s98_s17  ;;  %s109_s19 = int_to_ptr.vmem [resolvable:$true] %s108_s19 }
   0x7   :  { %s135_s20 = scalar_lea.vmem %s99_s17, 16  ;;  %s139_s21 = scalar_lea.vmem %s99_s17, 32 }
   0x8   :  { %p136_p0 = scmp.ne.s32.totalorder %s99_s17, %s135_s20  ;;  %p140_p1 = scmp.lt.s32.totalorder %s99_s17, %s99_s17 }
   0x9   :  { %p141_p2 = scmp.lt.s32.totalorder %s139_s21, %s135_s20 }
   0xb   :  { %v53_v41 = vld [vmem:[#allocation2] sm:$0x1]  ;;  %v71_v44 = vld [vmem:[#allocation3] sm:$0x1]  ;;  %p142_p3 = por %p141_p2, %p140_p1 }
   0xd   :  { %p143_p4 = pnand %p142_p3, %p136_p0 }
  0x1b   :  { %41 = vperm.xlu0 %130, %v24_v4  }
  0x92   :  { %v28_v6 = vpop.xlane.xlu0 %27 }
  0x93   :  { %v29_v7 = vsub.f32 %v23_v1, %v28_v6 }
  0x95   :  { %v30_v9 = vmul.f32 1.442695, %v29_v7 }
  0x97   :  { %131 = vpow2.f32 %v30_v9 }
  0x9a   :  { %v42_v11 = vpop.permute.xlu0 %41 }
  0x9b   :  { %vm43_vm2 = vcmp.eq.s32.totalorder %v39_v10, %v42_v11 }
  0x9c   :  { %v120_v12 = vsel %vm43_vm2, 1.0, %v184_v5 }
  0x9d   :  { %v46_v13 = vmul.f32 %v120_v12, %v23_v1 }
  0x9f   :  { %v47_v16 = vsel %vm25_vm0, %v46_v13, 0.0 }
  0xa1   :  { %v132_v14 = vpop.eup %131 }
  0xa2   :  { %v32_v15 = vsel %vm25_vm0, %v132_v14, 0.0 }
  0xa3   :  { %33 = vadd.xlane.f32.xlu1 %v32_v15 }
  0xa7   :  { %48 = vadd.xlane.f32.xlu1 %v47_v16 }
 0x130   :  { %v34_v17 = vpop.xlane.xlu1 %33 }
 0x131   :  { %133 = vlog2.f32 %v34_v17 }
 0x134   :  { %v49_v20 = vpop.xlane.xlu1 %48 }
 0x13b   :  { %v134_v18 = vpop.eup %133 }
 0x13c   :  { %v36_v19 = vmul.f32 0.6931472, %v134_v18 }
 0x13e   :  { %v37_v21 = vadd.f32 %v36_v19, %v28_v6 }
 0x140   :  { %v54_v23 = vsub.f32 %v37_v21, %v49_v20 }
 0x142   :  { %v55_v24 = vmul.f32 %v121_v22, %v54_v23 }
 0x144   :  { %v57_v25 = vsel %vm56_vm4, %v55_v24, 0.0 }
 0x145   :  { %58 = vadd.xlane.f32.xlu1 %v57_v25 }
 0x149   :  { %73 = vadd.xlane.f32.xlu1 %v72_v26 }
 0x1d2   :  { %v59_v27 = vpop.xlane.xlu1 %58 }
 0x1d3   :  { %v60_v28 = vrot.slane %v59_v27, 4 }
 0x1d5   :  { %v61_v29 = vadd.f32 %v60_v28, %v59_v27 }
 0x1d6   :  { %v74_v30 = vpop.xlane.xlu1 %73 }
 0x1d7   :  { %v62_v31 = vrot.slane %v61_v29, 2  ;;  %v75_v32 = vrot.slane %v74_v30, 4 }
 0x1d9   :  { %v76_v33 = vadd.f32 %v75_v32, %v74_v30  ;;  %v63_v34 = vadd.f32 %v62_v31, %v61_v29 }
 0x1db   :  { %v77_v35 = vrot.slane %v76_v33, 2  ;;  %v64_v36 = vrot.slane %v63_v34, 1 }
 0x1dd   :  { %v78_v37 = vadd.f32 %v77_v35, %v76_v33  ;;  %v65_v38 = vadd.f32 %v64_v36, %v63_v34 }
 0x1df   :  { %122 = vpush %v65_v38  ;;  %v79_v39 = vrot.slane %v78_v37, 1 }
 0x1e1   :  { %v80_v40 = vadd.f32 %v79_v39, %v78_v37 }
 0x1e3   :  { %124 = vpush %v80_v40 }
 0x210   :  { %s123_s0 = spop %122 }
 0x211   :  { %v67_v42 = vstv %s123_s0 }
 0x212   :  { %v68_v43 = vadd.f32 %v67_v42, %v53_v41 }
 0x214   :  { %70 = vst.msk [vmem:[#allocation2] sm:$0x1] %vm19_vm1, %v68_v43  ;;  %s125_s1 = spop %124 }
 0x215   :  { %v82_v45 = vstv %s125_s1 }
 0x216   :  { %v83_v46 = vadd.f32 %v82_v45, %v71_v44 }
 0x218   :  { %84 = vst.msk [vmem:[#allocation3] sm:$0x1] %vm19_vm1, %v83_v46 }
 0x21b   :  { %v88_v47 = vld [vmem:[#allocation2] sm:$0x1] }
 0x21c   :  { %89 = vst.msk [vmem:[#allocation4] sm:$0x1] %vm19_vm1, %v88_v47 }
 0x21d   :  { %146 = shalt.err (!%p143_p4)
}
 0x21e   :  { %s147_s24 = scalar_lea.hbm %s248_s2, 16 }
 0x21f   :  { %p148_p5 = scmp.ne.s32.totalorder %s248_s2, %s147_s24  ;;  %p151_p6 = scmp.lt.u32.totalorder %s147_s24, %s248_s2 }
 0x221   :  { %p153_p7 = pnand %p151_p6, %p148_p5 }
 0x223   :  { %156 = shalt.err (!%p153_p7)
}
 0x224   :  { %101 = dma.vmem_to_hbm [thread:$0]  %s99_s17, 16, %s248_s2, [#allocation5]   ;;  %v90_v48 = vld [vmem:[#allocation3] sm:$0x1] }
 0x225   :  { %91 = vst.msk [vmem:[#allocation6] sm:$0x1] %vm19_vm1, %v90_v48  ;;  %s157_s4 = scalar_lea.vmem %s109_s19, 16  ;;  %s161_s5 = scalar_lea.vmem %s109_s19, 32 }
 0x226   :  { %p158_p8 = scmp.ne.s32.totalorder %s109_s19, %s157_s4  ;;  %p162_p9 = scmp.lt.s32.totalorder %s109_s19, %s109_s19 }
 0x227   :  { %p163_p10 = scmp.lt.s32.totalorder %s161_s5, %s157_s4 }
 0x229   :  { %p164_p11 = por %p163_p10, %p162_p9 }
 0x22b   :  { %p165_p12 = pnand %p164_p11, %p158_p8 }
 0x22d   :  { %168 = shalt.err (!%p165_p12)
}
 0x22e   :  { %s169_s8 = scalar_lea.hbm %s249_s3, 16 }
 0x22f   :  { %p170_p13 = scmp.ne.s32.totalorder %s249_s3, %s169_s8  ;;  %p173_p0 = scmp.lt.u32.totalorder %s169_s8, %s249_s3 }
 0x231   :  { %p175_p1 = pnand %p173_p0, %p170_p13 }
 0x233   :  { %178 = shalt.err (!%p175_p1)
}
 0x234   :  { %111 = dma.vmem_to_hbm [thread:$0]  %s109_s19, 16, %s249_s3, [#allocation7]  }
 0x235   :  { %179 = dma.done.wait [#allocation5], 16  }
 0x236   :  { %180 = vsyncadd [#allocation5], 4294967280 }
 0x237   :  { %181 = dma.done.wait [#allocation7], 16  }
 0x238   :  { %182 = vsyncadd [#allocation7], 4294967280 }
 0x239   :  { %118 = vsyncpa [#allocation5], 1 }
 0x23a   :  { %119 = vsyncpa [#allocation7], 1 }

// kernel: run.22
= control target key start
LH: loop header
LB: loop body
LE: loop exit
PB: predicated region body
PF: predicated region fallthrough
CT: control target
= control target key end

     0   :  { %9 = vsyncpa [#allocation5], 0  ;;  %vm28_vm0 = vcmask 523264   ;;  %v228_v4 = vmov 0   ;;  %s301_s0 = inlined_call_operand.vmem [shape: bf16[16,64], index: 0, kind: input, shape index: {}]   ;;  %s302_s1 = inlined_call_operand.vmem [shape: s32[16,1], index: 1, kind: input, shape index: {}]   ;;  %s303_s2 = inlined_call_operand.hbm [shape: f32[1,1], index: 2, kind: output, shape index: {0}]   ;;  %s304_s3 = inlined_call_operand.hbm [shape: f32[1,1], index: 3, kind: output, shape index: {1}]  }
   0x1   :  { %v159_v0 = vld [vmem:[%s301_s0] sm:$0xff]   ;;  %170 = vset.pattern.permute.xlu1 %v228_v4  ;;  %171 = vset.pattern.permute.xlu0 %v228_v4 }
   0x2   :  { %v26_v1 = vld [vmem:[%s302_s1] sm:$0xff]  ;;  %v160_v2 = vunpack.c.l.bf16 %v159_v0  ;;  %v161_v3 = vunpack.c.h.bf16 %v159_v0 }
   0x3   :  { %10 = vsyncpa [#allocation7], 0  ;;  %56 = vperm.xlu1 %170, %v26_v1   ;;  %v27_v6 = vld [vmem:[%s302_s1 + $0x8] sm:$0xff]  ;;  %v53_v9 = vlaneseq  ;;  %v229_v18 = vmov 0.0   ;;  %vm75_vm3 = vcmp.ne.s32.totalorder %v26_v1, 4294967196  ;;  %vm86_vm5 = vcmask 7168  }
   0x4   :  { %v29_v5 = vsel %vm28_vm0, %v160_v2, -inf  ;;  %v32_v7 = vsel %vm28_vm0, %v161_v3, -inf  ;;  %vm76_vm4 = vcmp.ne.s32.totalorder %v27_v6, 4294967196  ;;  %v156_v29 = vsel %vm75_vm3, 1.0, %v229_v18  ;;  %s230_s18 = smov [#allocation4]   ;;  %s231_s20 = smov [#allocation6]  }
   0x5   :  { %30 = vmax.xlane.f32.xlu0 %v29_v5  ;;  %v54_v14 = vand.u32 127, %v53_v9  ;;  %v157_v30 = vsel %vm76_vm4, 1.0, %v229_v18  ;;  %v104_v31 = vsel %vm86_vm5, %v156_v29, 0.0  ;;  %vm19_vm6 = vcmask 0   ;;  %s132_s19 = sshll.u32 %s230_s18, 4  ;;  %s142_s21 = sshll.u32 %s231_s20, 4  ;;  %s133_s19 = int_to_ptr.vmem [resolvable:$true] %s132_s19  ;;  %s143_s21 = int_to_ptr.vmem [resolvable:$true] %s142_s21 }
   0x6   :  { %v105_v32 = vsel %vm86_vm5, %v157_v30, 0.0  ;;  %20 = vst.msk [vmem:[#allocation2] sm:$0x1] %vm19_vm6, %v229_v18  ;;  %21 = vst.msk [vmem:[#allocation3] sm:$0x1] %vm19_vm6, %v229_v18  ;;  %s180_s22 = scalar_lea.vmem %s133_s19, 16  ;;  %p185_p1 = scmp.lt.s32.totalorder %s133_s19, %s133_s19 }
   0x7   :  { %59 = vperm.xlu1 %170, %v27_v6   ;;  %v106_v33 = vadd.f32 %v105_v32, %v104_v31  ;;  %p181_p0 = scmp.ne.s32.totalorder %s133_s19, %s180_s22  ;;  %s184_s23 = scalar_lea.vmem %s133_s19, 32 }
   0x8   :  { %p186_p2 = scmp.lt.s32.totalorder %s184_s23, %s180_s22 }
   0x9   :  { %33 = vmax.xlane.f32.xlu0 %v32_v7 }
   0xa   :  { %p187_p3 = por %p186_p2, %p185_p1 }
   0xc   :  { %p188_p4 = pnand %p187_p3, %p181_p0 }
   0xd   :  { %v81_v1 = vld [vmem:[#allocation2] sm:$0x1]  ;;  %v103_v4 = vld [vmem:[#allocation3] sm:$0x1] }
  0x82   :  { %v57_v12 = vpop.permute.xlu1 %56 }
  0x83   :  { %vm61_vm1 = vcmp.eq.s32.totalorder %v54_v14, %v57_v12 }
  0x84   :  { %v154_v19 = vsel %vm61_vm1, 1.0, %v229_v18 }
  0x85   :  { %v67_v20 = vmul.f32 %v160_v2, %v154_v19 }
  0x86   :  { %v60_v17 = vpop.permute.xlu1 %59 }
  0x87   :  { %vm62_vm2 = vcmp.eq.s32.totalorder %v54_v14, %v60_v17  ;;  %v69_v24 = vsel %vm28_vm0, %v67_v20, 0.0 }
  0x88   :  { %v155_v22 = vsel %vm62_vm2, 1.0, %v229_v18 }
  0x89   :  { %v68_v25 = vmul.f32 %v161_v3, %v155_v22 }
  0x8b   :  { %v72_v28 = vsel %vm28_vm0, %v68_v25, 0.0 }
  0x92   :  { %v31_v8 = vpop.xlane.xlu0 %30 }
  0x93   :  { %v35_v10 = vsub.f32 %v160_v2, %v31_v8 }
  0x95   :  { %v37_v11 = vmul.f32 1.442695, %v35_v10 }
  0x96   :  { %v34_v13 = vpop.xlane.xlu0 %33 }
  0x97   :  { %172 = vpow2.f32 %v37_v11  ;;  %v36_v15 = vsub.f32 %v161_v3, %v34_v13 }
  0x99   :  { %v39_v16 = vmul.f32 1.442695, %v36_v15 }
  0x9b   :  { %174 = vpow2.f32 %v39_v16 }
  0xa1   :  { %v173_v21 = vpop.eup %172 }
  0xa2   :  { %v41_v23 = vsel %vm28_vm0, %v173_v21, 0.0 }
  0xa3   :  { %42 = vadd.xlane.f32.xlu0 %v41_v23 }
  0xa5   :  { %v175_v26 = vpop.eup %174 }
  0xa6   :  { %v44_v27 = vsel %vm28_vm0, %v175_v26, 0.0 }
  0xa7   :  { %45 = vadd.xlane.f32.xlu1 %v44_v27  ;;  %70 = vadd.xlane.f32.xlu0 %v69_v24 }
  0xab   :  { %73 = vadd.xlane.f32.xlu0 %v72_v28 }
 0x130   :  { %v43_v34 = vpop.xlane.xlu0 %42 }
 0x131   :  { %176 = vlog2.f32 %v43_v34 }
 0x134   :  { %v46_v35 = vpop.xlane.xlu1 %45  ;;  %v71_v38 = vpop.xlane.xlu0 %70 }
 0x135   :  { %178 = vlog2.f32 %v46_v35 }
 0x138   :  { %v74_v44 = vpop.xlane.xlu0 %73 }
 0x13b   :  { %v177_v36 = vpop.eup %176 }
 0x13c   :  { %v48_v37 = vmul.f32 0.6931472, %v177_v36 }
 0x13e   :  { %v51_v39 = vadd.f32 %v48_v37, %v31_v8 }
 0x13f   :  { %v179_v40 = vpop.eup %178 }
 0x140   :  { %v50_v41 = vmul.f32 0.6931472, %v179_v40  ;;  %v82_v42 = vsub.f32 %v51_v39, %v71_v38 }
 0x142   :  { %v52_v43 = vadd.f32 %v50_v41, %v34_v13  ;;  %v84_v45 = vmul.f32 %v156_v29, %v82_v42 }
 0x144   :  { %v83_v46 = vsub.f32 %v52_v43, %v74_v44  ;;  %v87_v48 = vsel %vm86_vm5, %v84_v45, 0.0 }
 0x146   :  { %v85_v47 = vmul.f32 %v157_v30, %v83_v46 }
 0x148   :  { %v88_v49 = vsel %vm86_vm5, %v85_v47, 0.0 }
 0x149   :  { %v89_v50 = vadd.f32 %v88_v49, %v87_v48 }
 0x14b   :  { %90 = vadd.xlane.f32.xlu0 %v89_v50 }
 0x14f   :  { %107 = vadd.xlane.f32.xlu0 %v106_v33 }
 0x1d8   :  { %v91_v51 = vpop.xlane.xlu0 %90 }
 0x1d9   :  { %v92_v52 = vrot.slane %v91_v51, 4 }
 0x1db   :  { %v93_v53 = vadd.f32 %v92_v52, %v91_v51 }
 0x1dc   :  { %v108_v54 = vpop.xlane.xlu0 %107 }
 0x1dd   :  { %v94_v55 = vrot.slane %v93_v53, 2  ;;  %v109_v56 = vrot.slane %v108_v54, 4 }
 0x1df   :  { %v110_v57 = vadd.f32 %v109_v56, %v108_v54  ;;  %v95_v58 = vadd.f32 %v94_v55, %v93_v53 }
 0x1e1   :  { %v111_v59 = vrot.slane %v110_v57, 2  ;;  %v96_v60 = vrot.slane %v95_v58, 1 }
 0x1e3   :  { %v112_v61 = vadd.f32 %v111_v59, %v110_v57  ;;  %v97_v62 = vadd.f32 %v96_v60, %v95_v58 }
 0x1e5   :  { %162 = vpush %v97_v62  ;;  %v113_v63 = vrot.slane %v112_v61, 1 }
 0x1e7   :  { %v114_v0 = vadd.f32 %v113_v63, %v112_v61 }
 0x1e9   :  { %164 = vpush %v114_v0 }
 0x216   :  { %s163_s0 = spop %162 }
 0x217   :  { %v99_v2 = vstv %s163_s0 }
 0x218   :  { %v100_v3 = vadd.f32 %v99_v2, %v81_v1 }
 0x21a   :  { %102 = vst.msk [vmem:[#allocation2] sm:$0x1] %vm19_vm6, %v100_v3  ;;  %s165_s1 = spop %164 }
 0x21b   :  { %v116_v5 = vstv %s165_s1 }
 0x21c   :  { %v117_v6 = vadd.f32 %v116_v5, %v103_v4 }
 0x21e   :  { %118 = vst.msk [vmem:[#allocation3] sm:$0x1] %vm19_vm6, %v117_v6 }
 0x221   :  { %v122_v7 = vld [vmem:[#allocation2] sm:$0x1] }
 0x222   :  { %123 = vst.msk [vmem:[#allocation4] sm:$0x1] %vm19_vm6, %v122_v7 }
 0x223   :  { %191 = shalt.err (!%p188_p4)
}
 0x224   :  { %s192_s26 = scalar_lea.hbm %s303_s2, 16 }
 0x225   :  { %p193_p5 = scmp.ne.s32.totalorder %s303_s2, %s192_s26  ;;  %p196_p6 = scmp.lt.u32.totalorder %s192_s26, %s303_s2 }
 0x227   :  { %p198_p7 = pnand %p196_p6, %p193_p5 }
 0x229   :  { %201 = shalt.err (!%p198_p7)
}
 0x22a   :  { %135 = dma.vmem_to_hbm [thread:$0]  %s133_s19, 16, %s303_s2, [#allocation5]   ;;  %v124_v8 = vld [vmem:[#allocation3] sm:$0x1] }
 0x22b   :  { %125 = vst.msk [vmem:[#allocation6] sm:$0x1] %vm19_vm6, %v124_v8  ;;  %s202_s6 = scalar_lea.vmem %s143_s21, 16  ;;  %s206_s7 = scalar_lea.vmem %s143_s21, 32 }
 0x22c   :  { %p203_p8 = scmp.ne.s32.totalorder %s143_s21, %s202_s6  ;;  %p207_p9 = scmp.lt.s32.totalorder %s143_s21, %s143_s21 }
 0x22d   :  { %p208_p10 = scmp.lt.s32.totalorder %s206_s7, %s202_s6 }
 0x22f   :  { %p209_p11 = por %p208_p10, %p207_p9 }
 0x231   :  { %p210_p12 = pnand %p209_p11, %p203_p8 }
 0x233   :  { %213 = shalt.err (!%p210_p12)
}
 0x234   :  { %s214_s10 = scalar_lea.hbm %s304_s3, 16 }
 0x235   :  { %p215_p13 = scmp.ne.s32.totalorder %s304_s3, %s214_s10  ;;  %p218_p0 = scmp.lt.u32.totalorder %s214_s10, %s304_s3 }
 0x237   :  { %p220_p1 = pnand %p218_p0, %p215_p13 }
 0x239   :  { %223 = shalt.err (!%p220_p1)
}
 0x23a   :  { %145 = dma.vmem_to_hbm [thread:$0]  %s143_s21, 16, %s304_s3, [#allocation7]  }
 0x23b   :  { %224 = dma.done.wait [#allocation5], 16  }
 0x23c   :  { %225 = vsyncadd [#allocation5], 4294967280 }
 0x23d   :  { %226 = dma.done.wait [#allocation7], 16  }
 0x23e   :  { %227 = vsyncadd [#allocation7], 4294967280 }
 0x23f   :  { %152 = vsyncpa [#allocation5], 1 }
 0x240   :  { %153 = vsyncpa [#allocation7], 1 }

</bundles_post_ra>
